<compile_context>
chip_gen: v7x
topology: tpu7x:2x2x1
jax: 0.10.0
libtpu: 0.0.40
codegen_flags: <defaults>
</compile_context>

<pallas_src>
import functools

import jax
import jax.numpy as jnp
from jax.experimental import pallas as pl
from jax.experimental.pallas import tpu as pltpu


# ----------------------------------------------------------------------------
# Fused kernel: all LSTM layers -> Linear -> LogSoftmax(dim=1)
# ----------------------------------------------------------------------------
def fused_block_lstm_kernel(num_layers, b_real, seq_len, batch_pad, x_ref, *refs):
    """refs layout: (w_ihT_0, w_hhT_0, b_0, ..., w_ihT_{n-1}, w_hhT_{n-1}, b_{n-1},
                     dense_wT, dense_b, out_ref)."""
    lstm_refs = [(refs[3 * l], refs[3 * l + 1], refs[3 * l + 2])
                 for l in range(num_layers)]
    dw_ref, db_ref, out_ref = refs[3 * num_layers:]

    L, Bp = seq_len, batch_pad
    H = lstm_refs[0][1].shape[0]            # w_hhT: (H, 4H)
    C = out_ref.shape[-1]

    # Current layer's input, laid out as one lane/sublane-dense (L*Bp, Din) slab.
    x_slab = x_ref[...]                     # f32

    for wih_ref, whh_ref, b_ref in lstm_refs:
        wih = wih_ref[...]                  # (Din, 4H)  lane-dense, MXU dtype (f32 or bf16)
        whh = whh_ref[...]                  # (H,   4H)  lane-dense, MXU dtype
        b = b_ref[...]                      # (1,   4H)  f32
        mxu_dt = wih.dtype

        # Hoisted input projection: one batched MXU call covering all timesteps.
        gates_x = jnp.dot(x_slab.astype(mxu_dt), wih,
                          preferred_element_type=jnp.float32) + b      # (L*Bp, 4H)

        h = jnp.zeros((Bp, H), jnp.float32)
        c = jnp.zeros((Bp, H), jnp.float32)
        outs = []
        for t in range(L):                  # recurrence: strictly sequential (L small -> unrolled)
            gates = gates_x[t * Bp:(t + 1) * Bp, :] + jnp.dot(
                h.astype(mxu_dt), whh, preferred_element_type=jnp.float32)   # (Bp, 4H)
            # Gate columns were permuted host-side to [i, f, o, g]:
            sig = jax.nn.sigmoid(gates[:, :3 * H])      # one EUP region for i, f, o
            i_g = sig[:, 0:H]
            f_g = sig[:, H:2 * H]
            o_g = sig[:, 2 * H:3 * H]
            g_g = jnp.tanh(gates[:, 3 * H:])            # one tanh for g
            c = f_g * c + i_g * g_g
            h = o_g * jnp.tanh(c)
            outs.append(h)
        x_slab = jnp.concatenate(outs, axis=0)          # (L*Bp, H) -> feeds the next layer

    # Dense layer: a single (L*Bp, H) @ (H, C) MXU call.
    logits = jnp.dot(x_slab.astype(dw_ref.dtype), dw_ref[...],
                     preferred_element_type=jnp.float32) + db_ref[...]   # (L*Bp, C)

    # LogSoftmax over dim=1 (the batch axis).  Zero-padded batch rows are clamped to -1e30
    # BEFORE the reduction so they can never poison max/sum; they are sliced off in the wrapper.
    neg = jnp.float32(-1e30)
    valid = jax.lax.broadcasted_iota(jnp.int32, (Bp, C), 0) < b_real     # hoisted, static
    for t in range(L):
        lt = jnp.where(valid, logits[t * Bp:(t + 1) * Bp, :], neg)       # (Bp, C)
        m = jnp.max(lt, axis=0, keepdims=True)
        z = lt - m
        lse = jnp.log(jnp.sum(jnp.exp(z), axis=0, keepdims=True))
        out_ref[t, :, :] = (z - lse).astype(out_ref.dtype)


# ----------------------------------------------------------------------------
# Host-side wrapper
# ----------------------------------------------------------------------------
def _reorder_gates(w, H):
    """Permute PyTorch LSTM gate blocks [i, f, g, o] -> [i, f, o, g] along the leading 4H axis."""
    return jnp.concatenate([w[0:H], w[H:2 * H], w[3 * H:4 * H], w[2 * H:3 * H]], axis=0)


def block_lstm_forward(x, params, mxu_dtype=jnp.float32):
    """x: (L, B, time_steps) -> log-probs (L, B, num_classes).

    mxu_dtype=jnp.bfloat16 feeds bf16 to the MXU (v6e/v7x fast path) while keeping f32
    accumulation and f32 gate/state math.
    """
    L, B, F = x.shape
    H = params["lstm"][0][1].shape[1]            # w_hh: (4H, H)
    C = params["dense_w"].shape[0]
    num_layers = len(params["lstm"])

    # Pad batch to a full sublane group (8); padded rows are masked out of the log-softmax
    # inside the kernel and sliced off below.
    Bp = max(8, -(-B // 8) * 8)
    x_p = x if Bp == B else jnp.pad(x, ((0, 0), (0, Bp - B), (0, 0)))
    x2 = x_p.reshape(L * Bp, F).astype(jnp.float32)     # (L*Bp, F) slab for the hoisted projection

    inputs = [x2]
    for (w_ih, w_hh, b_ih, b_hh) in params["lstm"]:
        # Reorder gates to [i, f, o, g] and pre-transpose once -> lane-dense (last dim = 4H).
        inputs.append(_reorder_gates(w_ih, H).T.astype(mxu_dtype))          # (Din, 4H)
        inputs.append(_reorder_gates(w_hh, H).T.astype(mxu_dtype))          # (H,   4H)
        inputs.append(_reorder_gates(b_ih + b_hh, H).reshape(1, -1).astype(jnp.float32))
    inputs.append(params["dense_w"].T.astype(mxu_dtype))                    # (H, C)
    inputs.append(params["dense_b"].reshape(1, -1).astype(jnp.float32))     # (1, C)

    vmem_spec = pl.BlockSpec(memory_space=pltpu.MemorySpace.VMEM)
    kernel = functools.partial(fused_block_lstm_kernel, num_layers, B, L, Bp)
    y_pad = pl.pallas_call(
        kernel,
        out_shape=jax.ShapeDtypeStruct((L, Bp, C), jnp.float32),
        in_specs=[vmem_spec] * len(inputs),
        out_specs=vmem_spec,
    )(*inputs)
    return y_pad[:, :B, :]


# ----------------------------------------------------------------------------
# Parameter init (deterministic, PyTorch-style uniform(-1/sqrt(H), 1/sqrt(H)))
# ----------------------------------------------------------------------------
def init_params(key, time_steps, num_variables, num_classes, lstm_hs):
    H = lstm_hs
    k = 1.0 / jnp.sqrt(H)
    params = {"lstm": []}
    for layer in range(num_variables):
        d_in = time_steps if layer == 0 else H
        key, k1, k2, k3, k4 = jax.random.split(key, 5)
        w_ih = jax.random.uniform(k1, (4 * H, d_in), jnp.float32, -k, k)
        w_hh = jax.random.uniform(k2, (4 * H, H), jnp.float32, -k, k)
        b_ih = jax.random.uniform(k3, (4 * H,), jnp.float32, -k, k)
        b_hh = jax.random.uniform(k4, (4 * H,), jnp.float32, -k, k)
        params["lstm"].append((w_ih, w_hh, b_ih, b_hh))
    key, k5, k6 = jax.random.split(key, 3)
    kd = 1.0 / jnp.sqrt(H)
    params["dense_w"] = jax.random.uniform(k5, (num_classes, H), jnp.float32, -kd, kd)
    params["dense_b"] = jax.random.uniform(k6, (num_classes,), jnp.float32, -kd, kd)
    return params


# ----------------------------------------------------------------------------
# Pure-JAX reference (correctness check only; original PyTorch gate order i,f,g,o)
# ----------------------------------------------------------------------------
def reference_forward(x, params):
    h_seq = x
    for (w_ih, w_hh, b_ih, b_hh) in params["lstm"]:
        H = w_hh.shape[1]
        B = x.shape[1]

        def step(carry, x_t):
            h, c = carry
            gates = x_t @ w_ih.T + h @ w_hh.T + b_ih + b_hh
            i = jax.nn.sigmoid(gates[:, 0:H])
            f = jax.nn.sigmoid(gates[:, H:2 * H])
            g = jnp.tanh(gates[:, 2 * H:3 * H])
            o = jax.nn.sigmoid(gates[:, 3 * H:4 * H])
            c = f * c + i * g
            h = o * jnp.tanh(c)
            return (h, c), h

        init = (jnp.zeros((B, H), jnp.float32), jnp.zeros((B, H), jnp.float32))
        _, h_seq = jax.lax.scan(step, init, h_seq)
    logits = jnp.einsum('lbh,ch->lbc', h_seq, params["dense_w"]) + params["dense_b"]
    return jax.nn.log_softmax(logits, axis=1)


if __name__ == "__main__":
    # Small shapes consistent with the module's forward:
    #   time_steps (=LSTM input_size) = 16, num_variables (=num_layers) = 2,
    #   num_classes = 5, lstm_hs = 32, seq_len L = 8, batch B = 4
    time_steps, num_variables, num_classes, lstm_hs = 16, 2, 5, 32
    L, B = 8, 4

    key = jax.random.PRNGKey(0)
    key, kx = jax.random.split(key)
    x = jax.random.normal(kx, (L, B, time_steps), jnp.float32)
    params = init_params(key, time_steps, num_variables, num_classes, lstm_hs)

    y_ref = jax.block_until_ready(reference_forward(x, params))

    # f32-MXU path: bit-tight parity with the pure-JAX reference.
    y = jax.block_until_ready(block_lstm_forward(x, params))
    assert y.shape == (L, B, num_classes)
    assert jnp.max(jnp.abs(y - y_ref)) < 5e-4, "f32 kernel mismatch vs JAX reference"

    # bf16-MXU-input fast path (v6e/v7x); accumulation and gate/state math stay f32,
    # so only a small precision drift vs the f32 reference is expected.
    y_bf = jax.block_until_ready(block_lstm_forward(x, params, mxu_dtype=jnp.bfloat16))
    assert jnp.max(jnp.abs(y_bf - y_ref)) < 5e-2, "bf16-MXU kernel drifted too far"

    print("KERNEL_OK")
</pallas_src>

<mosaic_0001>
module attributes {stable_mosaic.version = 11 : i64} {
  func.func @fused_block_lstm_kernel(%arg0: memref<64x16xf32, #tpu.memory_space<vmem>>, %arg1: memref<16x128xf32, #tpu.memory_space<vmem>>, %arg2: memref<32x128xf32, #tpu.memory_space<vmem>>, %arg3: memref<1x128xf32, #tpu.memory_space<vmem>>, %arg4: memref<32x128xf32, #tpu.memory_space<vmem>>, %arg5: memref<32x128xf32, #tpu.memory_space<vmem>>, %arg6: memref<1x128xf32, #tpu.memory_space<vmem>>, %arg7: memref<32x5xf32, #tpu.memory_space<vmem>>, %arg8: memref<1x5xf32, #tpu.memory_space<vmem>>, %arg9: memref<8x8x5xf32, #tpu.memory_space<vmem>>) attributes {dimension_semantics = [], scalar_prefetch = 0 : i64, scratch_operands = 0 : i64, tpu.core_type = #tpu.core_type<tc>} {
    %c0 = arith.constant 0 : index
    %c0_0 = arith.constant 0 : index
    %0 = vector.load %arg0[%c0, %c0_0] : memref<64x16xf32, #tpu.memory_space<vmem>>, vector<64x16xf32>
    %c0_1 = arith.constant 0 : index
    %c0_2 = arith.constant 0 : index
    %1 = vector.load %arg1[%c0_1, %c0_2] : memref<16x128xf32, #tpu.memory_space<vmem>>, vector<16x128xf32>
    %c0_3 = arith.constant 0 : index
    %c0_4 = arith.constant 0 : index
    %2 = vector.load %arg2[%c0_3, %c0_4] : memref<32x128xf32, #tpu.memory_space<vmem>>, vector<32x128xf32>
    %c0_5 = arith.constant 0 : index
    %c0_6 = arith.constant 0 : index
    %3 = vector.load %arg3[%c0_5, %c0_6] : memref<1x128xf32, #tpu.memory_space<vmem>>, vector<1x128xf32>
    %cst = arith.constant dense<0.000000e+00> : vector<64x128xf32>
    %4 = tpu.matmul %0, %1, %cst {dimension_numbers = #tpu.dot_dimension_numbers<[1], [0], [0], [1], [0, 0, 1, 1], [], []>} : vector<64x16xf32>, vector<16x128xf32>, vector<64x128xf32> -> vector<64x128xf32>
    %5 = vector.broadcast %3 : vector<1x128xf32> to vector<64x128xf32>
    %6 = arith.addf %4, %5 : vector<64x128xf32>
    %cst_7 = arith.constant 0.000000e+00 : f32
    %7 = vector.broadcast %cst_7 : f32 to vector<8x32xf32>
    %cst_8 = arith.constant 0.000000e+00 : f32
    %8 = vector.broadcast %cst_8 : f32 to vector<8x32xf32>
    %9 = vector.extract_strided_slice %6 {offsets = [0, 0], sizes = [8, 128], strides = [1, 1]} : vector<64x128xf32> to vector<8x128xf32>
    %cst_9 = arith.constant dense<0.000000e+00> : vector<8x128xf32>
    %10 = tpu.matmul %7, %2, %cst_9 {dimension_numbers = #tpu.dot_dimension_numbers<[1], [0], [0], [1], [0, 0, 1, 1], [], []>} : vector<8x32xf32>, vector<32x128xf32>, vector<8x128xf32> -> vector<8x128xf32>
    %11 = arith.addf %9, %10 : vector<8x128xf32>
    %12 = vector.extract_strided_slice %11 {offsets = [0, 0], sizes = [8, 96], strides = [1, 1]} : vector<8x128xf32> to vector<8x96xf32>
    %13 = arith.negf %12 : vector<8x96xf32>
    %14 = math.exp %13 : vector<8x96xf32>
    %cst_10 = arith.constant 1.000000e+00 : f32
    %15 = vector.broadcast %cst_10 : f32 to vector<8x96xf32>
    %16 = arith.addf %15, %14 : vector<8x96xf32>
    %17 = arith.divf %15, %16 : vector<8x96xf32>
    %18 = vector.extract_strided_slice %17 {offsets = [0, 0], sizes = [8, 32], strides = [1, 1]} : vector<8x96xf32> to vector<8x32xf32>
    %19 = vector.extract_strided_slice %17 {offsets = [0, 32], sizes = [8, 32], strides = [1, 1]} : vector<8x96xf32> to vector<8x32xf32>
    %20 = vector.extract_strided_slice %17 {offsets = [0, 64], sizes = [8, 32], strides = [1, 1]} : vector<8x96xf32> to vector<8x32xf32>
    %21 = vector.extract_strided_slice %11 {offsets = [0, 96], sizes = [8, 32], strides = [1, 1]} : vector<8x128xf32> to vector<8x32xf32>
    %22 = math.tanh %21 : vector<8x32xf32>
    %23 = arith.mulf %19, %8 : vector<8x32xf32>
    %24 = arith.mulf %18, %22 : vector<8x32xf32>
    %25 = arith.addf %23, %24 : vector<8x32xf32>
    %26 = math.tanh %25 : vector<8x32xf32>
    %27 = arith.mulf %20, %26 : vector<8x32xf32>
    %28 = vector.extract_strided_slice %6 {offsets = [8, 0], sizes = [8, 128], strides = [1, 1]} : vector<64x128xf32> to vector<8x128xf32>
    %cst_11 = arith.constant dense<0.000000e+00> : vector<8x128xf32>
    %29 = tpu.matmul %27, %2, %cst_11 {dimension_numbers = #tpu.dot_dimension_numbers<[1], [0], [0], [1], [0, 0, 1, 1], [], []>} : vector<8x32xf32>, vector<32x128xf32>, vector<8x128xf32> -> vector<8x128xf32>
    %30 = arith.addf %28, %29 : vector<8x128xf32>
    %31 = vector.extract_strided_slice %30 {offsets = [0, 0], sizes = [8, 96], strides = [1, 1]} : vector<8x128xf32> to vector<8x96xf32>
    %32 = arith.negf %31 : vector<8x96xf32>
    %33 = math.exp %32 : vector<8x96xf32>
    %cst_12 = arith.constant 1.000000e+00 : f32
    %34 = vector.broadcast %cst_12 : f32 to vector<8x96xf32>
    %35 = arith.addf %34, %33 : vector<8x96xf32>
    %36 = arith.divf %34, %35 : vector<8x96xf32>
    %37 = vector.extract_strided_slice %36 {offsets = [0, 0], sizes = [8, 32], strides = [1, 1]} : vector<8x96xf32> to vector<8x32xf32>
    %38 = vector.extract_strided_slice %36 {offsets = [0, 32], sizes = [8, 32], strides = [1, 1]} : vector<8x96xf32> to vector<8x32xf32>
    %39 = vector.extract_strided_slice %36 {offsets = [0, 64], sizes = [8, 32], strides = [1, 1]} : vector<8x96xf32> to vector<8x32xf32>
    %40 = vector.extract_strided_slice %30 {offsets = [0, 96], sizes = [8, 32], strides = [1, 1]} : vector<8x128xf32> to vector<8x32xf32>
    %41 = math.tanh %40 : vector<8x32xf32>
    %42 = arith.mulf %38, %25 : vector<8x32xf32>
    %43 = arith.mulf %37, %41 : vector<8x32xf32>
    %44 = arith.addf %42, %43 : vector<8x32xf32>
    %45 = math.tanh %44 : vector<8x32xf32>
    %46 = arith.mulf %39, %45 : vector<8x32xf32>
    %47 = vector.extract_strided_slice %6 {offsets = [16, 0], sizes = [8, 128], strides = [1, 1]} : vector<64x128xf32> to vector<8x128xf32>
    %cst_13 = arith.constant dense<0.000000e+00> : vector<8x128xf32>
    %48 = tpu.matmul %46, %2, %cst_13 {dimension_numbers = #tpu.dot_dimension_numbers<[1], [0], [0], [1], [0, 0, 1, 1], [], []>} : vector<8x32xf32>, vector<32x128xf32>, vector<8x128xf32> -> vector<8x128xf32>
    %49 = arith.addf %47, %48 : vector<8x128xf32>
    %50 = vector.extract_strided_slice %49 {offsets = [0, 0], sizes = [8, 96], strides = [1, 1]} : vector<8x128xf32> to vector<8x96xf32>
    %51 = arith.negf %50 : vector<8x96xf32>
    %52 = math.exp %51 : vector<8x96xf32>
    %cst_14 = arith.constant 1.000000e+00 : f32
    %53 = vector.broadcast %cst_14 : f32 to vector<8x96xf32>
    %54 = arith.addf %53, %52 : vector<8x96xf32>
    %55 = arith.divf %53, %54 : vector<8x96xf32>
    %56 = vector.extract_strided_slice %55 {offsets = [0, 0], sizes = [8, 32], strides = [1, 1]} : vector<8x96xf32> to vector<8x32xf32>
    %57 = vector.extract_strided_slice %55 {offsets = [0, 32], sizes = [8, 32], strides = [1, 1]} : vector<8x96xf32> to vector<8x32xf32>
    %58 = vector.extract_strided_slice %55 {offsets = [0, 64], sizes = [8, 32], strides = [1, 1]} : vector<8x96xf32> to vector<8x32xf32>
    %59 = vector.extract_strided_slice %49 {offsets = [0, 96], sizes = [8, 32], strides = [1, 1]} : vector<8x128xf32> to vector<8x32xf32>
    %60 = math.tanh %59 : vector<8x32xf32>
    %61 = arith.mulf %57, %44 : vector<8x32xf32>
    %62 = arith.mulf %56, %60 : vector<8x32xf32>
    %63 = arith.addf %61, %62 : vector<8x32xf32>
    %64 = math.tanh %63 : vector<8x32xf32>
    %65 = arith.mulf %58, %64 : vector<8x32xf32>
    %66 = vector.extract_strided_slice %6 {offsets = [24, 0], sizes = [8, 128], strides = [1, 1]} : vector<64x128xf32> to vector<8x128xf32>
    %cst_15 = arith.constant dense<0.000000e+00> : vector<8x128xf32>
    %67 = tpu.matmul %65, %2, %cst_15 {dimension_numbers = #tpu.dot_dimension_numbers<[1], [0], [0], [1], [0, 0, 1, 1], [], []>} : vector<8x32xf32>, vector<32x128xf32>, vector<8x128xf32> -> vector<8x128xf32>
    %68 = arith.addf %66, %67 : vector<8x128xf32>
    %69 = vector.extract_strided_slice %68 {offsets = [0, 0], sizes = [8, 96], strides = [1, 1]} : vector<8x128xf32> to vector<8x96xf32>
    %70 = arith.negf %69 : vector<8x96xf32>
    %71 = math.exp %70 : vector<8x96xf32>
    %cst_16 = arith.constant 1.000000e+00 : f32
    %72 = vector.broadcast %cst_16 : f32 to vector<8x96xf32>
    %73 = arith.addf %72, %71 : vector<8x96xf32>
    %74 = arith.divf %72, %73 : vector<8x96xf32>
    %75 = vector.extract_strided_slice %74 {offsets = [0, 0], sizes = [8, 32], strides = [1, 1]} : vector<8x96xf32> to vector<8x32xf32>
    %76 = vector.extract_strided_slice %74 {offsets = [0, 32], sizes = [8, 32], strides = [1, 1]} : vector<8x96xf32> to vector<8x32xf32>
    %77 = vector.extract_strided_slice %74 {offsets = [0, 64], sizes = [8, 32], strides = [1, 1]} : vector<8x96xf32> to vector<8x32xf32>
    %78 = vector.extract_strided_slice %68 {offsets = [0, 96], sizes = [8, 32], strides = [1, 1]} : vector<8x128xf32> to vector<8x32xf32>
    %79 = math.tanh %78 : vector<8x32xf32>
    %80 = arith.mulf %76, %63 : vector<8x32xf32>
    %81 = arith.mulf %75, %79 : vector<8x32xf32>
    %82 = arith.addf %80, %81 : vector<8x32xf32>
    %83 = math.tanh %82 : vector<8x32xf32>
    %84 = arith.mulf %77, %83 : vector<8x32xf32>
    %85 = vector.extract_strided_slice %6 {offsets = [32, 0], sizes = [8, 128], strides = [1, 1]} : vector<64x128xf32> to vector<8x128xf32>
    %cst_17 = arith.constant dense<0.000000e+00> : vector<8x128xf32>
    %86 = tpu.matmul %84, %2, %cst_17 {dimension_numbers = #tpu.dot_dimension_numbers<[1], [0], [0], [1], [0, 0, 1, 1], [], []>} : vector<8x32xf32>, vector<32x128xf32>, vector<8x128xf32> -> vector<8x128xf32>
    %87 = arith.addf %85, %86 : vector<8x128xf32>
    %88 = vector.extract_strided_slice %87 {offsets = [0, 0], sizes = [8, 96], strides = [1, 1]} : vector<8x128xf32> to vector<8x96xf32>
    %89 = arith.negf %88 : vector<8x96xf32>
    %90 = math.exp %89 : vector<8x96xf32>
    %cst_18 = arith.constant 1.000000e+00 : f32
    %91 = vector.broadcast %cst_18 : f32 to vector<8x96xf32>
    %92 = arith.addf %91, %90 : vector<8x96xf32>
    %93 = arith.divf %91, %92 : vector<8x96xf32>
    %94 = vector.extract_strided_slice %93 {offsets = [0, 0], sizes = [8, 32], strides = [1, 1]} : vector<8x96xf32> to vector<8x32xf32>
    %95 = vector.extract_strided_slice %93 {offsets = [0, 32], sizes = [8, 32], strides = [1, 1]} : vector<8x96xf32> to vector<8x32xf32>
    %96 = vector.extract_strided_slice %93 {offsets = [0, 64], sizes = [8, 32], strides = [1, 1]} : vector<8x96xf32> to vector<8x32xf32>
    %97 = vector.extract_strided_slice %87 {offsets = [0, 96], sizes = [8, 32], strides = [1, 1]} : vector<8x128xf32> to vector<8x32xf32>
    %98 = math.tanh %97 : vector<8x32xf32>
    %99 = arith.mulf %95, %82 : vector<8x32xf32>
    %100 = arith.mulf %94, %98 : vector<8x32xf32>
    %101 = arith.addf %99, %100 : vector<8x32xf32>
    %102 = math.tanh %101 : vector<8x32xf32>
    %103 = arith.mulf %96, %102 : vector<8x32xf32>
    %104 = vector.extract_strided_slice %6 {offsets = [40, 0], sizes = [8, 128], strides = [1, 1]} : vector<64x128xf32> to vector<8x128xf32>
    %cst_19 = arith.constant dense<0.000000e+00> : vector<8x128xf32>
    %105 = tpu.matmul %103, %2, %cst_19 {dimension_numbers = #tpu.dot_dimension_numbers<[1], [0], [0], [1], [0, 0, 1, 1], [], []>} : vector<8x32xf32>, vector<32x128xf32>, vector<8x128xf32> -> vector<8x128xf32>
    %106 = arith.addf %104, %105 : vector<8x128xf32>
    %107 = vector.extract_strided_slice %106 {offsets = [0, 0], sizes = [8, 96], strides = [1, 1]} : vector<8x128xf32> to vector<8x96xf32>
    %108 = arith.negf %107 : vector<8x96xf32>
    %109 = math.exp %108 : vector<8x96xf32>
    %cst_20 = arith.constant 1.000000e+00 : f32
    %110 = vector.broadcast %cst_20 : f32 to vector<8x96xf32>
    %111 = arith.addf %110, %109 : vector<8x96xf32>
    %112 = arith.divf %110, %111 : vector<8x96xf32>
    %113 = vector.extract_strided_slice %112 {offsets = [0, 0], sizes = [8, 32], strides = [1, 1]} : vector<8x96xf32> to vector<8x32xf32>
    %114 = vector.extract_strided_slice %112 {offsets = [0, 32], sizes = [8, 32], strides = [1, 1]} : vector<8x96xf32> to vector<8x32xf32>
    %115 = vector.extract_strided_slice %112 {offsets = [0, 64], sizes = [8, 32], strides = [1, 1]} : vector<8x96xf32> to vector<8x32xf32>
    %116 = vector.extract_strided_slice %106 {offsets = [0, 96], sizes = [8, 32], strides = [1, 1]} : vector<8x128xf32> to vector<8x32xf32>
    %117 = math.tanh %116 : vector<8x32xf32>
    %118 = arith.mulf %114, %101 : vector<8x32xf32>
    %119 = arith.mulf %113, %117 : vector<8x32xf32>
    %120 = arith.addf %118, %119 : vector<8x32xf32>
    %121 = math.tanh %120 : vector<8x32xf32>
    %122 = arith.mulf %115, %121 : vector<8x32xf32>
    %123 = vector.extract_strided_slice %6 {offsets = [48, 0], sizes = [8, 128], strides = [1, 1]} : vector<64x128xf32> to vector<8x128xf32>
    %cst_21 = arith.constant dense<0.000000e+00> : vector<8x128xf32>
    %124 = tpu.matmul %122, %2, %cst_21 {dimension_numbers = #tpu.dot_dimension_numbers<[1], [0], [0], [1], [0, 0, 1, 1], [], []>} : vector<8x32xf32>, vector<32x128xf32>, vector<8x128xf32> -> vector<8x128xf32>
    %125 = arith.addf %123, %124 : vector<8x128xf32>
    %126 = vector.extract_strided_slice %125 {offsets = [0, 0], sizes = [8, 96], strides = [1, 1]} : vector<8x128xf32> to vector<8x96xf32>
    %127 = arith.negf %126 : vector<8x96xf32>
    %128 = math.exp %127 : vector<8x96xf32>
    %cst_22 = arith.constant 1.000000e+00 : f32
    %129 = vector.broadcast %cst_22 : f32 to vector<8x96xf32>
    %130 = arith.addf %129, %128 : vector<8x96xf32>
    %131 = arith.divf %129, %130 : vector<8x96xf32>
    %132 = vector.extract_strided_slice %131 {offsets = [0, 0], sizes = [8, 32], strides = [1, 1]} : vector<8x96xf32> to vector<8x32xf32>
    %133 = vector.extract_strided_slice %131 {offsets = [0, 32], sizes = [8, 32], strides = [1, 1]} : vector<8x96xf32> to vector<8x32xf32>
    %134 = vector.extract_strided_slice %131 {offsets = [0, 64], sizes = [8, 32], strides = [1, 1]} : vector<8x96xf32> to vector<8x32xf32>
    %135 = vector.extract_strided_slice %125 {offsets = [0, 96], sizes = [8, 32], strides = [1, 1]} : vector<8x128xf32> to vector<8x32xf32>
    %136 = math.tanh %135 : vector<8x32xf32>
    %137 = arith.mulf %133, %120 : vector<8x32xf32>
    %138 = arith.mulf %132, %136 : vector<8x32xf32>
    %139 = arith.addf %137, %138 : vector<8x32xf32>
    %140 = math.tanh %139 : vector<8x32xf32>
    %141 = arith.mulf %134, %140 : vector<8x32xf32>
    %142 = vector.extract_strided_slice %6 {offsets = [56, 0], sizes = [8, 128], strides = [1, 1]} : vector<64x128xf32> to vector<8x128xf32>
    %cst_23 = arith.constant dense<0.000000e+00> : vector<8x128xf32>
    %143 = tpu.matmul %141, %2, %cst_23 {dimension_numbers = #tpu.dot_dimension_numbers<[1], [0], [0], [1], [0, 0, 1, 1], [], []>} : vector<8x32xf32>, vector<32x128xf32>, vector<8x128xf32> -> vector<8x128xf32>
    %144 = arith.addf %142, %143 : vector<8x128xf32>
    %145 = vector.extract_strided_slice %144 {offsets = [0, 0], sizes = [8, 96], strides = [1, 1]} : vector<8x128xf32> to vector<8x96xf32>
    %146 = arith.negf %145 : vector<8x96xf32>
    %147 = math.exp %146 : vector<8x96xf32>
    %cst_24 = arith.constant 1.000000e+00 : f32
    %148 = vector.broadcast %cst_24 : f32 to vector<8x96xf32>
    %149 = arith.addf %148, %147 : vector<8x96xf32>
    %150 = arith.divf %148, %149 : vector<8x96xf32>
    %151 = vector.extract_strided_slice %150 {offsets = [0, 0], sizes = [8, 32], strides = [1, 1]} : vector<8x96xf32> to vector<8x32xf32>
    %152 = vector.extract_strided_slice %150 {offsets = [0, 32], sizes = [8, 32], strides = [1, 1]} : vector<8x96xf32> to vector<8x32xf32>
    %153 = vector.extract_strided_slice %150 {offsets = [0, 64], sizes = [8, 32], strides = [1, 1]} : vector<8x96xf32> to vector<8x32xf32>
    %154 = vector.extract_strided_slice %144 {offsets = [0, 96], sizes = [8, 32], strides = [1, 1]} : vector<8x128xf32> to vector<8x32xf32>
    %155 = math.tanh %154 : vector<8x32xf32>
    %156 = arith.mulf %152, %139 : vector<8x32xf32>
    %157 = arith.mulf %151, %155 : vector<8x32xf32>
    %158 = arith.addf %156, %157 : vector<8x32xf32>
    %159 = math.tanh %158 : vector<8x32xf32>
    %160 = arith.mulf %153, %159 : vector<8x32xf32>
    %161 = tpu.concatenate %27, %46, %65, %84, %103, %122, %141, %160 in 0 : vector<8x32xf32>, vector<8x32xf32>, vector<8x32xf32>, vector<8x32xf32>, vector<8x32xf32>, vector<8x32xf32>, vector<8x32xf32>, vector<8x32xf32> -> vector<64x32xf32>
    %c0_25 = arith.constant 0 : index
    %c0_26 = arith.constant 0 : index
    %162 = vector.load %arg4[%c0_25, %c0_26] : memref<32x128xf32, #tpu.memory_space<vmem>>, vector<32x128xf32>
    %c0_27 = arith.constant 0 : index
    %c0_28 = arith.constant 0 : index
    %163 = vector.load %arg5[%c0_27, %c0_28] : memref<32x128xf32, #tpu.memory_space<vmem>>, vector<32x128xf32>
    %c0_29 = arith.constant 0 : index
    %c0_30 = arith.constant 0 : index
    %164 = vector.load %arg6[%c0_29, %c0_30] : memref<1x128xf32, #tpu.memory_space<vmem>>, vector<1x128xf32>
    %cst_31 = arith.constant dense<0.000000e+00> : vector<64x128xf32>
    %165 = tpu.matmul %161, %162, %cst_31 {dimension_numbers = #tpu.dot_dimension_numbers<[1], [0], [0], [1], [0, 0, 1, 1], [], []>} : vector<64x32xf32>, vector<32x128xf32>, vector<64x128xf32> -> vector<64x128xf32>
    %166 = vector.broadcast %164 : vector<1x128xf32> to vector<64x128xf32>
    %167 = arith.addf %165, %166 : vector<64x128xf32>
    %cst_32 = arith.constant 0.000000e+00 : f32
    %168 = vector.broadcast %cst_32 : f32 to vector<8x32xf32>
    %cst_33 = arith.constant 0.000000e+00 : f32
    %169 = vector.broadcast %cst_33 : f32 to vector<8x32xf32>
    %170 = vector.extract_strided_slice %167 {offsets = [0, 0], sizes = [8, 128], strides = [1, 1]} : vector<64x128xf32> to vector<8x128xf32>
    %cst_34 = arith.constant dense<0.000000e+00> : vector<8x128xf32>
    %171 = tpu.matmul %168, %163, %cst_34 {dimension_numbers = #tpu.dot_dimension_numbers<[1], [0], [0], [1], [0, 0, 1, 1], [], []>} : vector<8x32xf32>, vector<32x128xf32>, vector<8x128xf32> -> vector<8x128xf32>
    %172 = arith.addf %170, %171 : vector<8x128xf32>
    %173 = vector.extract_strided_slice %172 {offsets = [0, 0], sizes = [8, 96], strides = [1, 1]} : vector<8x128xf32> to vector<8x96xf32>
    %174 = arith.negf %173 : vector<8x96xf32>
    %175 = math.exp %174 : vector<8x96xf32>
    %cst_35 = arith.constant 1.000000e+00 : f32
    %176 = vector.broadcast %cst_35 : f32 to vector<8x96xf32>
    %177 = arith.addf %176, %175 : vector<8x96xf32>
    %178 = arith.divf %176, %177 : vector<8x96xf32>
    %179 = vector.extract_strided_slice %178 {offsets = [0, 0], sizes = [8, 32], strides = [1, 1]} : vector<8x96xf32> to vector<8x32xf32>
    %180 = vector.extract_strided_slice %178 {offsets = [0, 32], sizes = [8, 32], strides = [1, 1]} : vector<8x96xf32> to vector<8x32xf32>
    %181 = vector.extract_strided_slice %178 {offsets = [0, 64], sizes = [8, 32], strides = [1, 1]} : vector<8x96xf32> to vector<8x32xf32>
    %182 = vector.extract_strided_slice %172 {offsets = [0, 96], sizes = [8, 32], strides = [1, 1]} : vector<8x128xf32> to vector<8x32xf32>
    %183 = math.tanh %182 : vector<8x32xf32>
    %184 = arith.mulf %180, %169 : vector<8x32xf32>
    %185 = arith.mulf %179, %183 : vector<8x32xf32>
    %186 = arith.addf %184, %185 : vector<8x32xf32>
    %187 = math.tanh %186 : vector<8x32xf32>
    %188 = arith.mulf %181, %187 : vector<8x32xf32>
    %189 = vector.extract_strided_slice %167 {offsets = [8, 0], sizes = [8, 128], strides = [1, 1]} : vector<64x128xf32> to vector<8x128xf32>
    %cst_36 = arith.constant dense<0.000000e+00> : vector<8x128xf32>
    %190 = tpu.matmul %188, %163, %cst_36 {dimension_numbers = #tpu.dot_dimension_numbers<[1], [0], [0], [1], [0, 0, 1, 1], [], []>} : vector<8x32xf32>, vector<32x128xf32>, vector<8x128xf32> -> vector<8x128xf32>
    %191 = arith.addf %189, %190 : vector<8x128xf32>
    %192 = vector.extract_strided_slice %191 {offsets = [0, 0], sizes = [8, 96], strides = [1, 1]} : vector<8x128xf32> to vector<8x96xf32>
    %193 = arith.negf %192 : vector<8x96xf32>
    %194 = math.exp %193 : vector<8x96xf32>
    %cst_37 = arith.constant 1.000000e+00 : f32
    %195 = vector.broadcast %cst_37 : f32 to vector<8x96xf32>
    %196 = arith.addf %195, %194 : vector<8x96xf32>
    %197 = arith.divf %195, %196 : vector<8x96xf32>
    %198 = vector.extract_strided_slice %197 {offsets = [0, 0], sizes = [8, 32], strides = [1, 1]} : vector<8x96xf32> to vector<8x32xf32>
    %199 = vector.extract_strided_slice %197 {offsets = [0, 32], sizes = [8, 32], strides = [1, 1]} : vector<8x96xf32> to vector<8x32xf32>
    %200 = vector.extract_strided_slice %197 {offsets = [0, 64], sizes = [8, 32], strides = [1, 1]} : vector<8x96xf32> to vector<8x32xf32>
    %201 = vector.extract_strided_slice %191 {offsets = [0, 96], sizes = [8, 32], strides = [1, 1]} : vector<8x128xf32> to vector<8x32xf32>
    %202 = math.tanh %201 : vector<8x32xf32>
    %203 = arith.mulf %199, %186 : vector<8x32xf32>
    %204 = arith.mulf %198, %202 : vector<8x32xf32>
    %205 = arith.addf %203, %204 : vector<8x32xf32>
    %206 = math.tanh %205 : vector<8x32xf32>
    %207 = arith.mulf %200, %206 : vector<8x32xf32>
    %208 = vector.extract_strided_slice %167 {offsets = [16, 0], sizes = [8, 128], strides = [1, 1]} : vector<64x128xf32> to vector<8x128xf32>
    %cst_38 = arith.constant dense<0.000000e+00> : vector<8x128xf32>
    %209 = tpu.matmul %207, %163, %cst_38 {dimension_numbers = #tpu.dot_dimension_numbers<[1], [0], [0], [1], [0, 0, 1, 1], [], []>} : vector<8x32xf32>, vector<32x128xf32>, vector<8x128xf32> -> vector<8x128xf32>
    %210 = arith.addf %208, %209 : vector<8x128xf32>
    %211 = vector.extract_strided_slice %210 {offsets = [0, 0], sizes = [8, 96], strides = [1, 1]} : vector<8x128xf32> to vector<8x96xf32>
    %212 = arith.negf %211 : vector<8x96xf32>
    %213 = math.exp %212 : vector<8x96xf32>
    %cst_39 = arith.constant 1.000000e+00 : f32
    %214 = vector.broadcast %cst_39 : f32 to vector<8x96xf32>
    %215 = arith.addf %214, %213 : vector<8x96xf32>
    %216 = arith.divf %214, %215 : vector<8x96xf32>
    %217 = vector.extract_strided_slice %216 {offsets = [0, 0], sizes = [8, 32], strides = [1, 1]} : vector<8x96xf32> to vector<8x32xf32>
    %218 = vector.extract_strided_slice %216 {offsets = [0, 32], sizes = [8, 32], strides = [1, 1]} : vector<8x96xf32> to vector<8x32xf32>
    %219 = vector.extract_strided_slice %216 {offsets = [0, 64], sizes = [8, 32], strides = [1, 1]} : vector<8x96xf32> to vector<8x32xf32>
    %220 = vector.extract_strided_slice %210 {offsets = [0, 96], sizes = [8, 32], strides = [1, 1]} : vector<8x128xf32> to vector<8x32xf32>
    %221 = math.tanh %220 : vector<8x32xf32>
    %222 = arith.mulf %218, %205 : vector<8x32xf32>
    %223 = arith.mulf %217, %221 : vector<8x32xf32>
    %224 = arith.addf %222, %223 : vector<8x32xf32>
    %225 = math.tanh %224 : vector<8x32xf32>
    %226 = arith.mulf %219, %225 : vector<8x32xf32>
    %227 = vector.extract_strided_slice %167 {offsets = [24, 0], sizes = [8, 128], strides = [1, 1]} : vector<64x128xf32> to vector<8x128xf32>
    %cst_40 = arith.constant dense<0.000000e+00> : vector<8x128xf32>
    %228 = tpu.matmul %226, %163, %cst_40 {dimension_numbers = #tpu.dot_dimension_numbers<[1], [0], [0], [1], [0, 0, 1, 1], [], []>} : vector<8x32xf32>, vector<32x128xf32>, vector<8x128xf32> -> vector<8x128xf32>
    %229 = arith.addf %227, %228 : vector<8x128xf32>
    %230 = vector.extract_strided_slice %229 {offsets = [0, 0], sizes = [8, 96], strides = [1, 1]} : vector<8x128xf32> to vector<8x96xf32>
    %231 = arith.negf %230 : vector<8x96xf32>
    %232 = math.exp %231 : vector<8x96xf32>
    %cst_41 = arith.constant 1.000000e+00 : f32
    %233 = vector.broadcast %cst_41 : f32 to vector<8x96xf32>
    %234 = arith.addf %233, %232 : vector<8x96xf32>
    %235 = arith.divf %233, %234 : vector<8x96xf32>
    %236 = vector.extract_strided_slice %235 {offsets = [0, 0], sizes = [8, 32], strides = [1, 1]} : vector<8x96xf32> to vector<8x32xf32>
    %237 = vector.extract_strided_slice %235 {offsets = [0, 32], sizes = [8, 32], strides = [1, 1]} : vector<8x96xf32> to vector<8x32xf32>
    %238 = vector.extract_strided_slice %235 {offsets = [0, 64], sizes = [8, 32], strides = [1, 1]} : vector<8x96xf32> to vector<8x32xf32>
    %239 = vector.extract_strided_slice %229 {offsets = [0, 96], sizes = [8, 32], strides = [1, 1]} : vector<8x128xf32> to vector<8x32xf32>
    %240 = math.tanh %239 : vector<8x32xf32>
    %241 = arith.mulf %237, %224 : vector<8x32xf32>
    %242 = arith.mulf %236, %240 : vector<8x32xf32>
    %243 = arith.addf %241, %242 : vector<8x32xf32>
    %244 = math.tanh %243 : vector<8x32xf32>
    %245 = arith.mulf %238, %244 : vector<8x32xf32>
    %246 = vector.extract_strided_slice %167 {offsets = [32, 0], sizes = [8, 128], strides = [1, 1]} : vector<64x128xf32> to vector<8x128xf32>
    %cst_42 = arith.constant dense<0.000000e+00> : vector<8x128xf32>
    %247 = tpu.matmul %245, %163, %cst_42 {dimension_numbers = #tpu.dot_dimension_numbers<[1], [0], [0], [1], [0, 0, 1, 1], [], []>} : vector<8x32xf32>, vector<32x128xf32>, vector<8x128xf32> -> vector<8x128xf32>
    %248 = arith.addf %246, %247 : vector<8x128xf32>
    %249 = vector.extract_strided_slice %248 {offsets = [0, 0], sizes = [8, 96], strides = [1, 1]} : vector<8x128xf32> to vector<8x96xf32>
    %250 = arith.negf %249 : vector<8x96xf32>
    %251 = math.exp %250 : vector<8x96xf32>
    %cst_43 = arith.constant 1.000000e+00 : f32
    %252 = vector.broadcast %cst_43 : f32 to vector<8x96xf32>
    %253 = arith.addf %252, %251 : vector<8x96xf32>
    %254 = arith.divf %252, %253 : vector<8x96xf32>
    %255 = vector.extract_strided_slice %254 {offsets = [0, 0], sizes = [8, 32], strides = [1, 1]} : vector<8x96xf32> to vector<8x32xf32>
    %256 = vector.extract_strided_slice %254 {offsets = [0, 32], sizes = [8, 32], strides = [1, 1]} : vector<8x96xf32> to vector<8x32xf32>
    %257 = vector.extract_strided_slice %254 {offsets = [0, 64], sizes = [8, 32], strides = [1, 1]} : vector<8x96xf32> to vector<8x32xf32>
    %258 = vector.extract_strided_slice %248 {offsets = [0, 96], sizes = [8, 32], strides = [1, 1]} : vector<8x128xf32> to vector<8x32xf32>
    %259 = math.tanh %258 : vector<8x32xf32>
    %260 = arith.mulf %256, %243 : vector<8x32xf32>
    %261 = arith.mulf %255, %259 : vector<8x32xf32>
    %262 = arith.addf %260, %261 : vector<8x32xf32>
    %263 = math.tanh %262 : vector<8x32xf32>
    %264 = arith.mulf %257, %263 : vector<8x32xf32>
    %265 = vector.extract_strided_slice %167 {offsets = [40, 0], sizes = [8, 128], strides = [1, 1]} : vector<64x128xf32> to vector<8x128xf32>
    %cst_44 = arith.constant dense<0.000000e+00> : vector<8x128xf32>
    %266 = tpu.matmul %264, %163, %cst_44 {dimension_numbers = #tpu.dot_dimension_numbers<[1], [0], [0], [1], [0, 0, 1, 1], [], []>} : vector<8x32xf32>, vector<32x128xf32>, vector<8x128xf32> -> vector<8x128xf32>
    %267 = arith.addf %265, %266 : vector<8x128xf32>
    %268 = vector.extract_strided_slice %267 {offsets = [0, 0], sizes = [8, 96], strides = [1, 1]} : vector<8x128xf32> to vector<8x96xf32>
    %269 = arith.negf %268 : vector<8x96xf32>
    %270 = math.exp %269 : vector<8x96xf32>
    %cst_45 = arith.constant 1.000000e+00 : f32
    %271 = vector.broadcast %cst_45 : f32 to vector<8x96xf32>
    %272 = arith.addf %271, %270 : vector<8x96xf32>
    %273 = arith.divf %271, %272 : vector<8x96xf32>
    %274 = vector.extract_strided_slice %273 {offsets = [0, 0], sizes = [8, 32], strides = [1, 1]} : vector<8x96xf32> to vector<8x32xf32>
    %275 = vector.extract_strided_slice %273 {offsets = [0, 32], sizes = [8, 32], strides = [1, 1]} : vector<8x96xf32> to vector<8x32xf32>
    %276 = vector.extract_strided_slice %273 {offsets = [0, 64], sizes = [8, 32], strides = [1, 1]} : vector<8x96xf32> to vector<8x32xf32>
    %277 = vector.extract_strided_slice %267 {offsets = [0, 96], sizes = [8, 32], strides = [1, 1]} : vector<8x128xf32> to vector<8x32xf32>
    %278 = math.tanh %277 : vector<8x32xf32>
    %279 = arith.mulf %275, %262 : vector<8x32xf32>
    %280 = arith.mulf %274, %278 : vector<8x32xf32>
    %281 = arith.addf %279, %280 : vector<8x32xf32>
    %282 = math.tanh %281 : vector<8x32xf32>
    %283 = arith.mulf %276, %282 : vector<8x32xf32>
    %284 = vector.extract_strided_slice %167 {offsets = [48, 0], sizes = [8, 128], strides = [1, 1]} : vector<64x128xf32> to vector<8x128xf32>
    %cst_46 = arith.constant dense<0.000000e+00> : vector<8x128xf32>
    %285 = tpu.matmul %283, %163, %cst_46 {dimension_numbers = #tpu.dot_dimension_numbers<[1], [0], [0], [1], [0, 0, 1, 1], [], []>} : vector<8x32xf32>, vector<32x128xf32>, vector<8x128xf32> -> vector<8x128xf32>
    %286 = arith.addf %284, %285 : vector<8x128xf32>
    %287 = vector.extract_strided_slice %286 {offsets = [0, 0], sizes = [8, 96], strides = [1, 1]} : vector<8x128xf32> to vector<8x96xf32>
    %288 = arith.negf %287 : vector<8x96xf32>
    %289 = math.exp %288 : vector<8x96xf32>
    %cst_47 = arith.constant 1.000000e+00 : f32
    %290 = vector.broadcast %cst_47 : f32 to vector<8x96xf32>
    %291 = arith.addf %290, %289 : vector<8x96xf32>
    %292 = arith.divf %290, %291 : vector<8x96xf32>
    %293 = vector.extract_strided_slice %292 {offsets = [0, 0], sizes = [8, 32], strides = [1, 1]} : vector<8x96xf32> to vector<8x32xf32>
    %294 = vector.extract_strided_slice %292 {offsets = [0, 32], sizes = [8, 32], strides = [1, 1]} : vector<8x96xf32> to vector<8x32xf32>
    %295 = vector.extract_strided_slice %292 {offsets = [0, 64], sizes = [8, 32], strides = [1, 1]} : vector<8x96xf32> to vector<8x32xf32>
    %296 = vector.extract_strided_slice %286 {offsets = [0, 96], sizes = [8, 32], strides = [1, 1]} : vector<8x128xf32> to vector<8x32xf32>
    %297 = math.tanh %296 : vector<8x32xf32>
    %298 = arith.mulf %294, %281 : vector<8x32xf32>
    %299 = arith.mulf %293, %297 : vector<8x32xf32>
    %300 = arith.addf %298, %299 : vector<8x32xf32>
    %301 = math.tanh %300 : vector<8x32xf32>
    %302 = arith.mulf %295, %301 : vector<8x32xf32>
    %303 = vector.extract_strided_slice %167 {offsets = [56, 0], sizes = [8, 128], strides = [1, 1]} : vector<64x128xf32> to vector<8x128xf32>
    %cst_48 = arith.constant dense<0.000000e+00> : vector<8x128xf32>
    %304 = tpu.matmul %302, %163, %cst_48 {dimension_numbers = #tpu.dot_dimension_numbers<[1], [0], [0], [1], [0, 0, 1, 1], [], []>} : vector<8x32xf32>, vector<32x128xf32>, vector<8x128xf32> -> vector<8x128xf32>
    %305 = arith.addf %303, %304 : vector<8x128xf32>
    %306 = vector.extract_strided_slice %305 {offsets = [0, 0], sizes = [8, 96], strides = [1, 1]} : vector<8x128xf32> to vector<8x96xf32>
    %307 = arith.negf %306 : vector<8x96xf32>
    %308 = math.exp %307 : vector<8x96xf32>
    %cst_49 = arith.constant 1.000000e+00 : f32
    %309 = vector.broadcast %cst_49 : f32 to vector<8x96xf32>
    %310 = arith.addf %309, %308 : vector<8x96xf32>
    %311 = arith.divf %309, %310 : vector<8x96xf32>
    %312 = vector.extract_strided_slice %311 {offsets = [0, 0], sizes = [8, 32], strides = [1, 1]} : vector<8x96xf32> to vector<8x32xf32>
    %313 = vector.extract_strided_slice %311 {offsets = [0, 32], sizes = [8, 32], strides = [1, 1]} : vector<8x96xf32> to vector<8x32xf32>
    %314 = vector.extract_strided_slice %311 {offsets = [0, 64], sizes = [8, 32], strides = [1, 1]} : vector<8x96xf32> to vector<8x32xf32>
    %315 = vector.extract_strided_slice %305 {offsets = [0, 96], sizes = [8, 32], strides = [1, 1]} : vector<8x128xf32> to vector<8x32xf32>
    %316 = math.tanh %315 : vector<8x32xf32>
    %317 = arith.mulf %313, %300 : vector<8x32xf32>
    %318 = arith.mulf %312, %316 : vector<8x32xf32>
    %319 = arith.addf %317, %318 : vector<8x32xf32>
    %320 = math.tanh %319 : vector<8x32xf32>
    %321 = arith.mulf %314, %320 : vector<8x32xf32>
    %322 = tpu.concatenate %188, %207, %226, %245, %264, %283, %302, %321 in 0 : vector<8x32xf32>, vector<8x32xf32>, vector<8x32xf32>, vector<8x32xf32>, vector<8x32xf32>, vector<8x32xf32>, vector<8x32xf32>, vector<8x32xf32> -> vector<64x32xf32>
    %c0_50 = arith.constant 0 : index
    %c0_51 = arith.constant 0 : index
    %323 = vector.load %arg7[%c0_50, %c0_51] : memref<32x5xf32, #tpu.memory_space<vmem>>, vector<32x5xf32>
    %cst_52 = arith.constant dense<0.000000e+00> : vector<64x5xf32>
    %324 = tpu.matmul %322, %323, %cst_52 {dimension_numbers = #tpu.dot_dimension_numbers<[1], [0], [0], [1], [0, 0, 1, 1], [], []>} : vector<64x32xf32>, vector<32x5xf32>, vector<64x5xf32> -> vector<64x5xf32>
    %c0_53 = arith.constant 0 : index
    %c0_54 = arith.constant 0 : index
    %325 = vector.load %arg8[%c0_53, %c0_54] : memref<1x5xf32, #tpu.memory_space<vmem>>, vector<1x5xf32>
    %326 = vector.broadcast %325 : vector<1x5xf32> to vector<64x5xf32>
    %327 = arith.addf %324, %326 : vector<64x5xf32>
    %328 = tpu.iota {dimensions = array<i32: 0>} : vector<8x5xi32>
    %c4_i32 = arith.constant 4 : i32
    %329 = vector.broadcast %c4_i32 : i32 to vector<8x5xi32>
    %330 = arith.cmpi slt, %328, %329 : vector<8x5xi32>
    %331 = vector.extract_strided_slice %327 {offsets = [0, 0], sizes = [8, 5], strides = [1, 1]} : vector<64x5xf32> to vector<8x5xf32>
    %cst_55 = arith.constant -1.000000e+30 : f32
    %332 = vector.broadcast %cst_55 : f32 to vector<8x5xf32>
    %333 = arith.select %330, %331, %332 : vector<8x5xi1>, vector<8x5xf32>
    %cst_56 = arith.constant dense<0xFF800000> : vector<5xf32>
    %334 = vector.multi_reduction <maximumf>, %333, %cst_56 [0] : vector<8x5xf32> to vector<5xf32>
    %335 = vector.shape_cast %334 : vector<5xf32> to vector<1x5xf32>
    %336 = vector.broadcast %335 : vector<1x5xf32> to vector<8x5xf32>
    %337 = arith.subf %333, %336 : vector<8x5xf32>
    %338 = math.exp %337 : vector<8x5xf32>
    %cst_57 = arith.constant dense<0.000000e+00> : vector<5xf32>
    %339 = vector.multi_reduction <add>, %338, %cst_57 [0] : vector<8x5xf32> to vector<5xf32>
    %340 = vector.shape_cast %339 : vector<5xf32> to vector<1x5xf32>
    %341 = math.log %340 : vector<1x5xf32>
    %342 = vector.broadcast %341 : vector<1x5xf32> to vector<8x5xf32>
    %343 = arith.subf %337, %342 : vector<8x5xf32>
    %c0_58 = arith.constant 0 : index
    %c0_59 = arith.constant 0 : index
    %c0_60 = arith.constant 0 : index
    %344 = vector.load %arg9[%c0_58, %c0_59, %c0_60] : memref<8x8x5xf32, #tpu.memory_space<vmem>>, vector<1x8x5xf32>
    %345 = vector.shape_cast %344 : vector<1x8x5xf32> to vector<8x5xf32>
    %346 = vector.shape_cast %343 : vector<8x5xf32> to vector<1x8x5xf32>
    tpu.vector_store %arg9[%c0_58, %c0_59, %c0_60], %346 {strides = array<i32>} : memref<8x8x5xf32, #tpu.memory_space<vmem>>, vector<1x8x5xf32>,
    %347 = vector.extract_strided_slice %327 {offsets = [8, 0], sizes = [8, 5], strides = [1, 1]} : vector<64x5xf32> to vector<8x5xf32>
    %cst_61 = arith.constant -1.000000e+30 : f32
    %348 = vector.broadcast %cst_61 : f32 to vector<8x5xf32>
    %349 = arith.select %330, %347, %348 : vector<8x5xi1>, vector<8x5xf32>
    %cst_62 = arith.constant dense<0xFF800000> : vector<5xf32>
    %350 = vector.multi_reduction <maximumf>, %349, %cst_62 [0] : vector<8x5xf32> to vector<5xf32>
    %351 = vector.shape_cast %350 : vector<5xf32> to vector<1x5xf32>
    %352 = vector.broadcast %351 : vector<1x5xf32> to vector<8x5xf32>
    %353 = arith.subf %349, %352 : vector<8x5xf32>
    %354 = math.exp %353 : vector<8x5xf32>
    %cst_63 = arith.constant dense<0.000000e+00> : vector<5xf32>
    %355 = vector.multi_reduction <add>, %354, %cst_63 [0] : vector<8x5xf32> to vector<5xf32>
    %356 = vector.shape_cast %355 : vector<5xf32> to vector<1x5xf32>
    %357 = math.log %356 : vector<1x5xf32>
    %358 = vector.broadcast %357 : vector<1x5xf32> to vector<8x5xf32>
    %359 = arith.subf %353, %358 : vector<8x5xf32>
    %c1 = arith.constant 1 : index
    %c0_64 = arith.constant 0 : index
    %c0_65 = arith.constant 0 : index
    %360 = vector.load %arg9[%c1, %c0_64, %c0_65] : memref<8x8x5xf32, #tpu.memory_space<vmem>>, vector<1x8x5xf32>
    %361 = vector.shape_cast %360 : vector<1x8x5xf32> to vector<8x5xf32>
    %362 = vector.shape_cast %359 : vector<8x5xf32> to vector<1x8x5xf32>
    tpu.vector_store %arg9[%c1, %c0_64, %c0_65], %362 {strides = array<i32>} : memref<8x8x5xf32, #tpu.memory_space<vmem>>, vector<1x8x5xf32>,
    %363 = vector.extract_strided_slice %327 {offsets = [16, 0], sizes = [8, 5], strides = [1, 1]} : vector<64x5xf32> to vector<8x5xf32>
    %cst_66 = arith.constant -1.000000e+30 : f32
    %364 = vector.broadcast %cst_66 : f32 to vector<8x5xf32>
    %365 = arith.select %330, %363, %364 : vector<8x5xi1>, vector<8x5xf32>
    %cst_67 = arith.constant dense<0xFF800000> : vector<5xf32>
    %366 = vector.multi_reduction <maximumf>, %365, %cst_67 [0] : vector<8x5xf32> to vector<5xf32>
    %367 = vector.shape_cast %366 : vector<5xf32> to vector<1x5xf32>
    %368 = vector.broadcast %367 : vector<1x5xf32> to vector<8x5xf32>
    %369 = arith.subf %365, %368 : vector<8x5xf32>
    %370 = math.exp %369 : vector<8x5xf32>
    %cst_68 = arith.constant dense<0.000000e+00> : vector<5xf32>
    %371 = vector.multi_reduction <add>, %370, %cst_68 [0] : vector<8x5xf32> to vector<5xf32>
    %372 = vector.shape_cast %371 : vector<5xf32> to vector<1x5xf32>
    %373 = math.log %372 : vector<1x5xf32>
    %374 = vector.broadcast %373 : vector<1x5xf32> to vector<8x5xf32>
    %375 = arith.subf %369, %374 : vector<8x5xf32>
    %c2 = arith.constant 2 : index
    %c0_69 = arith.constant 0 : index
    %c0_70 = arith.constant 0 : index
    %376 = vector.load %arg9[%c2, %c0_69, %c0_70] : memref<8x8x5xf32, #tpu.memory_space<vmem>>, vector<1x8x5xf32>
    %377 = vector.shape_cast %376 : vector<1x8x5xf32> to vector<8x5xf32>
    %378 = vector.shape_cast %375 : vector<8x5xf32> to vector<1x8x5xf32>
    tpu.vector_store %arg9[%c2, %c0_69, %c0_70], %378 {strides = array<i32>} : memref<8x8x5xf32, #tpu.memory_space<vmem>>, vector<1x8x5xf32>,
    %379 = vector.extract_strided_slice %327 {offsets = [24, 0], sizes = [8, 5], strides = [1, 1]} : vector<64x5xf32> to vector<8x5xf32>
    %cst_71 = arith.constant -1.000000e+30 : f32
    %380 = vector.broadcast %cst_71 : f32 to vector<8x5xf32>
    %381 = arith.select %330, %379, %380 : vector<8x5xi1>, vector<8x5xf32>
    %cst_72 = arith.constant dense<0xFF800000> : vector<5xf32>
    %382 = vector.multi_reduction <maximumf>, %381, %cst_72 [0] : vector<8x5xf32> to vector<5xf32>
    %383 = vector.shape_cast %382 : vector<5xf32> to vector<1x5xf32>
    %384 = vector.broadcast %383 : vector<1x5xf32> to vector<8x5xf32>
    %385 = arith.subf %381, %384 : vector<8x5xf32>
    %386 = math.exp %385 : vector<8x5xf32>
    %cst_73 = arith.constant dense<0.000000e+00> : vector<5xf32>
    %387 = vector.multi_reduction <add>, %386, %cst_73 [0] : vector<8x5xf32> to vector<5xf32>
    %388 = vector.shape_cast %387 : vector<5xf32> to vector<1x5xf32>
    %389 = math.log %388 : vector<1x5xf32>
    %390 = vector.broadcast %389 : vector<1x5xf32> to vector<8x5xf32>
    %391 = arith.subf %385, %390 : vector<8x5xf32>
    %c3 = arith.constant 3 : index
    %c0_74 = arith.constant 0 : index
    %c0_75 = arith.constant 0 : index
    %392 = vector.load %arg9[%c3, %c0_74, %c0_75] : memref<8x8x5xf32, #tpu.memory_space<vmem>>, vector<1x8x5xf32>
    %393 = vector.shape_cast %392 : vector<1x8x5xf32> to vector<8x5xf32>
    %394 = vector.shape_cast %391 : vector<8x5xf32> to vector<1x8x5xf32>
    tpu.vector_store %arg9[%c3, %c0_74, %c0_75], %394 {strides = array<i32>} : memref<8x8x5xf32, #tpu.memory_space<vmem>>, vector<1x8x5xf32>,
    %395 = vector.extract_strided_slice %327 {offsets = [32, 0], sizes = [8, 5], strides = [1, 1]} : vector<64x5xf32> to vector<8x5xf32>
    %cst_76 = arith.constant -1.000000e+30 : f32
    %396 = vector.broadcast %cst_76 : f32 to vector<8x5xf32>
    %397 = arith.select %330, %395, %396 : vector<8x5xi1>, vector<8x5xf32>
    %cst_77 = arith.constant dense<0xFF800000> : vector<5xf32>
    %398 = vector.multi_reduction <maximumf>, %397, %cst_77 [0] : vector<8x5xf32> to vector<5xf32>
    %399 = vector.shape_cast %398 : vector<5xf32> to vector<1x5xf32>
    %400 = vector.broadcast %399 : vector<1x5xf32> to vector<8x5xf32>
    %401 = arith.subf %397, %400 : vector<8x5xf32>
    %402 = math.exp %401 : vector<8x5xf32>
    %cst_78 = arith.constant dense<0.000000e+00> : vector<5xf32>
    %403 = vector.multi_reduction <add>, %402, %cst_78 [0] : vector<8x5xf32> to vector<5xf32>
    %404 = vector.shape_cast %403 : vector<5xf32> to vector<1x5xf32>
    %405 = math.log %404 : vector<1x5xf32>
    %406 = vector.broadcast %405 : vector<1x5xf32> to vector<8x5xf32>
    %407 = arith.subf %401, %406 : vector<8x5xf32>
    %c4 = arith.constant 4 : index
    %c0_79 = arith.constant 0 : index
    %c0_80 = arith.constant 0 : index
    %408 = vector.load %arg9[%c4, %c0_79, %c0_80] : memref<8x8x5xf32, #tpu.memory_space<vmem>>, vector<1x8x5xf32>
    %409 = vector.shape_cast %408 : vector<1x8x5xf32> to vector<8x5xf32>
    %410 = vector.shape_cast %407 : vector<8x5xf32> to vector<1x8x5xf32>
    tpu.vector_store %arg9[%c4, %c0_79, %c0_80], %410 {strides = array<i32>} : memref<8x8x5xf32, #tpu.memory_space<vmem>>, vector<1x8x5xf32>,
    %411 = vector.extract_strided_slice %327 {offsets = [40, 0], sizes = [8, 5], strides = [1, 1]} : vector<64x5xf32> to vector<8x5xf32>
    %cst_81 = arith.constant -1.000000e+30 : f32
    %412 = vector.broadcast %cst_81 : f32 to vector<8x5xf32>
    %413 = arith.select %330, %411, %412 : vector<8x5xi1>, vector<8x5xf32>
    %cst_82 = arith.constant dense<0xFF800000> : vector<5xf32>
    %414 = vector.multi_reduction <maximumf>, %413, %cst_82 [0] : vector<8x5xf32> to vector<5xf32>
    %415 = vector.shape_cast %414 : vector<5xf32> to vector<1x5xf32>
    %416 = vector.broadcast %415 : vector<1x5xf32> to vector<8x5xf32>
    %417 = arith.subf %413, %416 : vector<8x5xf32>
    %418 = math.exp %417 : vector<8x5xf32>
    %cst_83 = arith.constant dense<0.000000e+00> : vector<5xf32>
    %419 = vector.multi_reduction <add>, %418, %cst_83 [0] : vector<8x5xf32> to vector<5xf32>
    %420 = vector.shape_cast %419 : vector<5xf32> to vector<1x5xf32>
    %421 = math.log %420 : vector<1x5xf32>
    %422 = vector.broadcast %421 : vector<1x5xf32> to vector<8x5xf32>
    %423 = arith.subf %417, %422 : vector<8x5xf32>
    %c5 = arith.constant 5 : index
    %c0_84 = arith.constant 0 : index
    %c0_85 = arith.constant 0 : index
    %424 = vector.load %arg9[%c5, %c0_84, %c0_85] : memref<8x8x5xf32, #tpu.memory_space<vmem>>, vector<1x8x5xf32>
    %425 = vector.shape_cast %424 : vector<1x8x5xf32> to vector<8x5xf32>
    %426 = vector.shape_cast %423 : vector<8x5xf32> to vector<1x8x5xf32>
    tpu.vector_store %arg9[%c5, %c0_84, %c0_85], %426 {strides = array<i32>} : memref<8x8x5xf32, #tpu.memory_space<vmem>>, vector<1x8x5xf32>,
    %427 = vector.extract_strided_slice %327 {offsets = [48, 0], sizes = [8, 5], strides = [1, 1]} : vector<64x5xf32> to vector<8x5xf32>
    %cst_86 = arith.constant -1.000000e+30 : f32
    %428 = vector.broadcast %cst_86 : f32 to vector<8x5xf32>
    %429 = arith.select %330, %427, %428 : vector<8x5xi1>, vector<8x5xf32>
    %cst_87 = arith.constant dense<0xFF800000> : vector<5xf32>
    %430 = vector.multi_reduction <maximumf>, %429, %cst_87 [0] : vector<8x5xf32> to vector<5xf32>
    %431 = vector.shape_cast %430 : vector<5xf32> to vector<1x5xf32>
    %432 = vector.broadcast %431 : vector<1x5xf32> to vector<8x5xf32>
    %433 = arith.subf %429, %432 : vector<8x5xf32>
    %434 = math.exp %433 : vector<8x5xf32>
    %cst_88 = arith.constant dense<0.000000e+00> : vector<5xf32>
    %435 = vector.multi_reduction <add>, %434, %cst_88 [0] : vector<8x5xf32> to vector<5xf32>
    %436 = vector.shape_cast %435 : vector<5xf32> to vector<1x5xf32>
    %437 = math.log %436 : vector<1x5xf32>
    %438 = vector.broadcast %437 : vector<1x5xf32> to vector<8x5xf32>
    %439 = arith.subf %433, %438 : vector<8x5xf32>
    %c6 = arith.constant 6 : index
    %c0_89 = arith.constant 0 : index
    %c0_90 = arith.constant 0 : index
    %440 = vector.load %arg9[%c6, %c0_89, %c0_90] : memref<8x8x5xf32, #tpu.memory_space<vmem>>, vector<1x8x5xf32>
    %441 = vector.shape_cast %440 : vector<1x8x5xf32> to vector<8x5xf32>
    %442 = vector.shape_cast %439 : vector<8x5xf32> to vector<1x8x5xf32>
    tpu.vector_store %arg9[%c6, %c0_89, %c0_90], %442 {strides = array<i32>} : memref<8x8x5xf32, #tpu.memory_space<vmem>>, vector<1x8x5xf32>,
    %443 = vector.extract_strided_slice %327 {offsets = [56, 0], sizes = [8, 5], strides = [1, 1]} : vector<64x5xf32> to vector<8x5xf32>
    %cst_91 = arith.constant -1.000000e+30 : f32
    %444 = vector.broadcast %cst_91 : f32 to vector<8x5xf32>
    %445 = arith.select %330, %443, %444 : vector<8x5xi1>, vector<8x5xf32>
    %cst_92 = arith.constant dense<0xFF800000> : vector<5xf32>
    %446 = vector.multi_reduction <maximumf>, %445, %cst_92 [0] : vector<8x5xf32> to vector<5xf32>
    %447 = vector.shape_cast %446 : vector<5xf32> to vector<1x5xf32>
    %448 = vector.broadcast %447 : vector<1x5xf32> to vector<8x5xf32>
    %449 = arith.subf %445, %448 : vector<8x5xf32>
    %450 = math.exp %449 : vector<8x5xf32>
    %cst_93 = arith.constant dense<0.000000e+00> : vector<5xf32>
    %451 = vector.multi_reduction <add>, %450, %cst_93 [0] : vector<8x5xf32> to vector<5xf32>
    %452 = vector.shape_cast %451 : vector<5xf32> to vector<1x5xf32>
    %453 = math.log %452 : vector<1x5xf32>
    %454 = vector.broadcast %453 : vector<1x5xf32> to vector<8x5xf32>
    %455 = arith.subf %449, %454 : vector<8x5xf32>
    %c7 = arith.constant 7 : index
    %c0_94 = arith.constant 0 : index
    %c0_95 = arith.constant 0 : index
    %456 = vector.load %arg9[%c7, %c0_94, %c0_95] : memref<8x8x5xf32, #tpu.memory_space<vmem>>, vector<1x8x5xf32>
    %457 = vector.shape_cast %456 : vector<1x8x5xf32> to vector<8x5xf32>
    %458 = vector.shape_cast %455 : vector<8x5xf32> to vector<1x8x5xf32>
    tpu.vector_store %arg9[%c7, %c0_94, %c0_95], %458 {strides = array<i32>} : memref<8x8x5xf32, #tpu.memory_space<vmem>>, vector<1x8x5xf32>,
    return
  }
}

</mosaic_0001>

<bundles_post_ra>
// kernel: tpu_custom_call.1
= control target key start
LH: loop header
LB: loop body
LE: loop exit
PB: predicated region body
PF: predicated region fallthrough
CT: control target
= control target key end

     0   :  { %vm53_vm0 = vcmask 130048   ;;  %v2907_v10 = vmov 0.0|0.0   ;;  %vm2908_vm1 = vmmov 0   ;;  %v2909_v16 = vmov 0.0   ;;  %s2910_s12 = smov 32   ;;  %s3455_s1 = inlined_call_operand.vmem [shape: f32[16,128], index: 1, kind: input, shape index: {}]   ;;  %s3456_s0 = inlined_call_operand.vmem [shape: f32[64,16], index: 0, kind: input, shape index: {}]   ;;  %s3457_s2 = inlined_call_operand.vmem [shape: f32[32,128], index: 2, kind: input, shape index: {}]   ;;  %s3458_s3 = inlined_call_operand.vmem [shape: f32[1,128], index: 3, kind: input, shape index: {}]   ;;  %s3459_s4 = inlined_call_operand.vmem [shape: f32[32,128], index: 4, kind: input, shape index: {}]   ;;  %s3460_s5 = inlined_call_operand.vmem [shape: f32[32,128], index: 5, kind: input, shape index: {}]   ;;  %s3461_s6 = inlined_call_operand.vmem [shape: f32[1,128], index: 6, kind: input, shape index: {}]   ;;  %s3462_s7 = inlined_call_operand.vmem [shape: f32[32,5], index: 7, kind: input, shape index: {}]   ;;  %s3463_s8 = inlined_call_operand.vmem [shape: f32[1,5], index: 8, kind: input, shape index: {}]   ;;  %s3464_s9 = inlined_call_operand.vmem [shape: f32[8,8,5], index: 9, kind: output, shape index: {}]  }
   0x1   :  { %v40_v0 = vld [vmem:[%s3455_s1] sm:$0xff]  ;;  %v41_v1 = vld [vmem:[%s3455_s1 + $0x8] sm:$0xff]  ;;  %v38_v11 = vld [vmem:[%s3456_s0 + $0x30] sm:$0xff]  ;;  %vm183_vm2 = vcmask 261120   ;;  %vm2027_vm4 = vcmask 39936  }
   0x2   :  { %v36_v2 = vld [vmem:[%s3456_s0 + $0x20] sm:$0xff]  ;;  %v2624_v3 = vpack.c.bf16 %v41_v1, %v40_v0  ;;  %v43_v5 = vld [vmem:[%s3457_s2 + $0x8] sm:$0xff]  ;;  %v44_v12 = vld [vmem:[%s3457_s2 + $0x10] sm:$0xff] }
   0x3   :  { %2402 = vmatprep.mubr.msk.f32.mxu1 %vm53_vm0, %v36_v2  ;;  %v42_v4 = vld [vmem:[%s3457_s2] sm:$0xff]  ;;  %v37_v7 = vld [vmem:[%s3456_s0 + $0x28] sm:$0xff]  ;;  %v45_v13 = vld [vmem:[%s3457_s2 + $0x18] sm:$0xff] }
   0x4   :  { %v32_v6 = vld [vmem:[%s3456_s0] sm:$0xff]  ;;  %2740 = vmatprep.subr.bf16.mxu1 %v2624_v3  ;;  %2625 = vmatprep.subr.bf16.mxu0 %v2624_v3  ;;  %v2984_v8 = vpack.c.bf16 %v43_v5, %v42_v4  ;;  %v33_v9 = vld [vmem:[%s3456_s0 + $0x8] sm:$0xff]  ;;  %v39_v14 = vld [vmem:[%s3456_s0 + $0x38] sm:$0xff]  ;;  %v3008_v15 = vpack.c.bf16 %v45_v13, %v44_v12 }
   0x5   :  { %2741 = vmatpush3.bf16.msra.mxu1 %v2624_v3  ;;  %2627 = vmatpush3.bf16.msra.mxu0 %v2624_v3  ;;  %v3034_v21 = vld [vmem:[%s3458_s3] ss:$0 sm:$0xff]  ;;  %s2911_s3 = smov 64   ;;  %v34_v56 = vld [vmem:[%s3456_s0 + $0x10] sm:$0xff]  ;;  %v35_v57 = vld [vmem:[%s3456_s0 + $0x18] sm:$0xff] }
   0x6   :  { %2628 = vmatprep.subr.bf16.mxu1 %v2907_v10  ;;  %2396 = vmatprep.mubr.msk.f32.mxu0 %vm53_vm0, %v32_v6 }
   0x7   :  { %2640 = vmatprep.subr.bf16.mxu0 %v2907_v10 }
   0x8   :  { %2403 = vmatmul.mubr.msk.f32.vlgmr.msra.gmra.mrb[0].mxu1 %vm53_vm0, %v37_v7  ;;  %2397 = vmatmul.mubr.msk.f32.vlgmr.msra.gmra.mrb[0].mxu0 %vm53_vm0, %v33_v9 }
   0x9   :  { %2630 = vmatpush3.bf16.msra.mxu1 %v2984_v8  ;;  %2405 = vmatprep.mubr.msk.f32.mxu1 %vm53_vm0, %v38_v11 }
   0xa   :  { %2631 = vmatprep.subr.bf16.mxu1 %v2907_v10  ;;  %2642 = vmatpush3.bf16.msra.mxu0 %v2984_v8 }
   0xb   :  { %2643 = vmatprep.subr.bf16.mxu0 %v2907_v10  ;;  %2399 = vmatprep.mubr.msk.f32.mxu0 %vm53_vm0, %v34_v56 }
   0xc   :  { %2406 = vmatmul.mubr.msk.f32.gmra.mrb[2].mxu1 %vm53_vm0, %v39_v14  ;;  %2400 = vmatmul.mubr.msk.f32.gmra.mrb[2].mxu0 %vm53_vm0, %v35_v57 }
   0xd   :  { %2633 = vmatpush3.bf16.msra.mxu1 %v3008_v15  ;;  %2416 = vmatprep.mubr.msk.f32.mxu1 %vm2908_vm1, %v2909_v16 }
   0xe   :  { %2634 = vmatprep.subr.bf16.mxu1 %v2907_v10  ;;  %2645 = vmatpush3.bf16.msra.mxu0 %v3008_v15 }
   0xf   :  { %2652 = vmatprep.subr.bf16.mxu0 %v2907_v10  ;;  %2438 = vmatprep.mubr.msk.f32.mxu0 %vm2908_vm1, %v2909_v16 }
  0x10   :  { %2417 = vmatmul.mubr.f32.vlgmr.msra.gmra.mrb[4].mxu1 %v2909_v16 }
  0x11   :  { %2636 = vmatpush3.bf16.msra.mxu1 %v2984_v8  ;;  %2427 = vmatprep.mubr.msk.f32.mxu1 %vm2908_vm1, %v2909_v16 }
  0x12   :  { %2637 = vmatprep.subr.bf16.mxu1 %v2907_v10 }
  0x15   :  { %2639 = vmatpush3.bf16.msra.mxu1 %v3008_v15 }
  0x16   :  { %2646 = vmatprep.subr.bf16.mxu1 %v2907_v10 }
  0xdb   :  { %v3027_v17 = vpop.f32.mrb[0].mxu1  ;;  %v2398_v18 = vpop.f32.mrb[0].mxu0 }
  0xdc   :  { %v3029_v19 = vpop.f32.mrb[1].mxu1  ;;  %v144_v20 = vpop.f32.mrb[1].mxu0  ;;  %v150_v42 = vadd.f32 %v2398_v18, %v3034_v21 }
  0xdd   :  { %v145_v24 = vadd.f32 %v3034_v21, %v144_v20 }
  0xdf   :  { %v3036_v22 = vpop.f32.mrb[2].mxu1  ;;  %v2401_v61 = vpop.f32.mrb[2].mxu0 }
  0xe0   :  { %v3038_v23 = vpop.f32.mrb[3].mxu1  ;;  %v154_v62 = vpop.f32.mrb[3].mxu0 }
  0xe1   :  { %v155_v0 = vadd.f32 %v3034_v21, %v154_v62 }
  0xe3   :  { %v253_v25 = vpop.f32.mrb[4].mxu1 }
  0xe4   :  { %v257_v26 = vadd.f32 %v253_v25, %v145_v24  ;;  %v2418_v27 = vpop.f32.mrb[5].mxu1 }
  0xe5   :  { %v160_v27 = vadd.f32 %v2401_v61, %v3034_v21 }
  0xe6   :  { %2747 = vtanh.f32 %v257_v26  ;;  %v2223_v29 = vmul.f32 -1.442695, %v257_v26 }
  0xe8   :  { %2749 = vpow2.f32 %v2223_v29 }
  0xf0   :  { %v2748_v28 = vpop.eup %2747 }
  0xf1   :  { %267 = vrot.lane.b32.xlu0 %v2748_v28, %s2910_s12 }
  0xf2   :  { %v2750_v30 = vpop.eup %2749 }
  0xf3   :  { %v261_v31 = vadd.f32 1.0, %v2750_v30 }
  0xf5   :  { %2751 = vrcp.f32 %v261_v31 }
  0xff   :  { %v2752_v32 = vpop.eup %2751 }
 0x100   :  { %v265_v35 = vmul.f32 0.0, %v2752_v32 }
 0x163   :  { %v268_v33 = vpop.permute.xlu0 %267 }
 0x164   :  { %v270_v34 = vmul.f32 %v2752_v32, %v268_v33 }
 0x166   :  { %272 = vrot.lane.b32.xlu0 %v270_v34, %s2910_s12 }
 0x1d8   :  { %v273_v36 = vpop.permute.xlu0 %272 }
 0x1d9   :  { %v275_v37 = vadd.f32 %v273_v36, %v265_v35 }
 0x1db   :  { %2753 = vtanh.f32 %v275_v37 }
 0x1e5   :  { %v2754_v38 = vpop.eup %2753 }
 0x1e6   :  { %278 = vrot.lane.b32.xlu1 %v2754_v38, %s2910_s12 }
 0x258   :  { %v279_v39 = vpop.permute.xlu1 %278 }
 0x259   :  { %v281_v40 = vmul.f32 %v2752_v32, %v279_v39 }
 0x25b   :  { %283 = vrot.lane.b32.xlu1 %v281_v40, %s2911_s3 }
 0x2cd   :  { %v3045_v41 = vpop.permute.xlu1 %283 }
 0x2ce   :  { %2428 = vmatmul.mubr.msk.f32.vlgmr.msra.gmra.mrb[6].mxu1 %vm183_vm2, %v3045_v41 }
 0x2cf   :  { %2648 = vmatpush3.bf16.msra.mxu1 %v2984_v8  ;;  %2449 = vmatprep.mubr.msk.f32.mxu1 %vm2908_vm1, %v2909_v16 }
 0x2d0   :  { %2649 = vmatprep.subr.bf16.mxu1 %v2907_v10 }
 0x2d3   :  { %2651 = vmatpush3.bf16.msra.mxu1 %v3008_v15 }
 0x2d4   :  { %2658 = vmatprep.subr.bf16.mxu1 %v2907_v10 }
 0x3a1   :  { %v353_v43 = vpop.f32.mrb[6].mxu1 }
 0x3a2   :  { %v357_v44 = vadd.f32 %v353_v43, %v150_v42  ;;  %v2429_v45 = vpop.f32.mrb[7].mxu1 }
 0x3a4   :  { %2755 = vtanh.f32 %v357_v44  ;;  %v2225_v47 = vmul.f32 -1.442695, %v357_v44 }
 0x3a6   :  { %2757 = vpow2.f32 %v2225_v47 }
 0x3ae   :  { %v2756_v46 = vpop.eup %2755 }
 0x3af   :  { %367 = vrot.lane.b32.xlu0 %v2756_v46, %s2910_s12  ;;  %v165_v46 = vadd.f32 %v3034_v21, %v3029_v19 }
 0x3b0   :  { %v2758_v48 = vpop.eup %2757 }
 0x3b1   :  { %v361_v49 = vadd.f32 1.0, %v2758_v48 }
 0x3b3   :  { %2759 = vrcp.f32 %v361_v49 }
 0x3bd   :  { %v2760_v50 = vpop.eup %2759 }
 0x3be   :  { %v365_v53 = vmul.f32 %v2760_v50, %v275_v37 }
 0x421   :  { %v368_v51 = vpop.permute.xlu0 %367 }
 0x422   :  { %v370_v52 = vmul.f32 %v2760_v50, %v368_v51 }
 0x424   :  { %372 = vrot.lane.b32.xlu1 %v370_v52, %s2910_s12 }
 0x496   :  { %v373_v54 = vpop.permute.xlu1 %372 }
 0x497   :  { %v375_v55 = vadd.f32 %v373_v54, %v365_v53 }
 0x499   :  { %2761 = vtanh.f32 %v375_v55 }
 0x4a3   :  { %v2762_v58 = vpop.eup %2761 }
 0x4a4   :  { %378 = vrot.lane.b32.xlu0 %v2762_v58, %s2910_s12 }
 0x516   :  { %v379_v59 = vpop.permute.xlu0 %378 }
 0x517   :  { %v381_v60 = vmul.f32 %v2760_v50, %v379_v59 }
 0x519   :  { %383 = vrot.lane.b32.xlu1 %v381_v60, %s2911_s3 }
 0x58b   :  { %v3070_v63 = vpop.permute.xlu1 %383 }
 0x58c   :  { %2439 = vmatmul.mubr.msk.f32.vlgmr.msra.gmra.mrb[4].mxu0 %vm183_vm2, %v3070_v63 }
 0x58d   :  { %2654 = vmatpush3.bf16.msra.mxu0 %v2984_v8  ;;  %2460 = vmatprep.mubr.msk.f32.mxu0 %vm2908_vm1, %v2909_v16 }
 0x58e   :  { %2655 = vmatprep.subr.bf16.mxu0 %v2907_v10 }
 0x591   :  { %2657 = vmatpush3.bf16.msra.mxu0 %v3008_v15 }
 0x592   :  { %2664 = vmatprep.subr.bf16.mxu0 %v2907_v10 }
 0x65f   :  { %v453_v1 = vpop.f32.mrb[4].mxu0 }
 0x660   :  { %v457_v2 = vadd.f32 %v453_v1, %v155_v0  ;;  %v2440_v3 = vpop.f32.mrb[5].mxu0  ;;  %v170_v0 = vadd.f32 %v3027_v17, %v3034_v21 }
 0x662   :  { %2763 = vtanh.f32 %v457_v2  ;;  %v2227_v5 = vmul.f32 -1.442695, %v457_v2 }
 0x664   :  { %2765 = vpow2.f32 %v2227_v5 }
 0x66c   :  { %v2764_v4 = vpop.eup %2763 }
 0x66d   :  { %467 = vrot.lane.b32.xlu0 %v2764_v4, %s2910_s12 }
 0x66e   :  { %v2766_v6 = vpop.eup %2765 }
 0x66f   :  { %v461_v7 = vadd.f32 1.0, %v2766_v6 }
 0x671   :  { %2767 = vrcp.f32 %v461_v7 }
 0x67b   :  { %v2768_v9 = vpop.eup %2767 }
 0x67c   :  { %v465_v13 = vmul.f32 %v2768_v9, %v375_v55 }
 0x6df   :  { %v468_v11 = vpop.permute.xlu0 %467 }
 0x6e0   :  { %v470_v12 = vmul.f32 %v2768_v9, %v468_v11 }
 0x6e2   :  { %472 = vrot.lane.b32.xlu1 %v470_v12, %s2910_s12 }
 0x754   :  { %v473_v14 = vpop.permute.xlu1 %472 }
 0x755   :  { %v475_v18 = vadd.f32 %v473_v14, %v465_v13  ;;  %v982_v13 = vld [vmem:[%s3459_s4] sm:$0xff]  ;;  %v983_v14 = vld [vmem:[%s3459_s4 + $0x8] sm:$0xff] }
 0x757   :  { %2769 = vtanh.f32 %v475_v18 }
 0x761   :  { %v2770_v20 = vpop.eup %2769 }
 0x762   :  { %478 = vrot.lane.b32.xlu0 %v2770_v20, %s2910_s12 }
 0x7d4   :  { %v479_v24 = vpop.permute.xlu0 %478 }
 0x7d5   :  { %v481_v25 = vmul.f32 %v2768_v9, %v479_v24 }
 0x7d7   :  { %483 = vrot.lane.b32.xlu1 %v481_v25, %s2911_s3 }
 0x849   :  { %v3085_v26 = vpop.permute.xlu1 %483 }
 0x84a   :  { %2450 = vmatmul.mubr.msk.f32.vlgmr.msra.gmra.mrb[8].mxu1 %vm183_vm2, %v3085_v26 }
 0x84b   :  { %2660 = vmatpush3.bf16.msra.mxu1 %v2984_v8  ;;  %2471 = vmatprep.mubr.msk.f32.mxu1 %vm2908_vm1, %v2909_v16 }
 0x84c   :  { %2661 = vmatprep.subr.bf16.mxu1 %v2907_v10 }
 0x84f   :  { %2663 = vmatpush3.bf16.msra.mxu1 %v3008_v15 }
 0x850   :  { %2670 = vmatprep.subr.bf16.mxu1 %v2907_v10 }
 0x91d   :  { %v553_v28 = vpop.f32.mrb[8].mxu1 }
 0x91e   :  { %v557_v29 = vadd.f32 %v553_v28, %v160_v27  ;;  %v2451_v30 = vpop.f32.mrb[9].mxu1  ;;  %v984_v27 = vld [vmem:[%s3459_s4 + $0x10] sm:$0xff]  ;;  %v985_v28 = vld [vmem:[%s3459_s4 + $0x18] sm:$0xff] }
 0x920   :  { %2771 = vtanh.f32 %v557_v29  ;;  %v2229_v32 = vmul.f32 -1.442695, %v557_v29  ;;  %v2680_v29 = vpack.c.bf16 %v985_v28, %v984_v27 }
 0x922   :  { %2773 = vpow2.f32 %v2229_v32 }
 0x92a   :  { %v2772_v31 = vpop.eup %2771 }
 0x92b   :  { %567 = vrot.lane.b32.xlu0 %v2772_v31, %s2910_s12 }
 0x92c   :  { %v2774_v33 = vpop.eup %2773 }
 0x92d   :  { %v561_v34 = vadd.f32 1.0, %v2774_v33 }
 0x92f   :  { %2775 = vrcp.f32 %v561_v34 }
 0x939   :  { %v2776_v35 = vpop.eup %2775 }
 0x93a   :  { %v565_v38 = vmul.f32 %v2776_v35, %v475_v18  ;;  %v2676_v18 = vpack.c.bf16 %v983_v14, %v982_v13 }
 0x99d   :  { %v568_v36 = vpop.permute.xlu0 %567 }
 0x99e   :  { %v570_v37 = vmul.f32 %v2776_v35, %v568_v36 }
 0x9a0   :  { %572 = vrot.lane.b32.xlu1 %v570_v37, %s2910_s12 }
 0xa12   :  { %v573_v39 = vpop.permute.xlu1 %572 }
 0xa13   :  { %v575_v40 = vadd.f32 %v573_v39, %v565_v38 }
 0xa15   :  { %2777 = vtanh.f32 %v575_v40 }
 0xa1f   :  { %v2778_v42 = vpop.eup %2777 }
 0xa20   :  { %578 = vrot.lane.b32.xlu0 %v2778_v42, %s2910_s12 }
 0xa92   :  { %v579_v43 = vpop.permute.xlu0 %578 }
 0xa93   :  { %v581_v44 = vmul.f32 %v2776_v35, %v579_v43 }
 0xa95   :  { %583 = vrot.lane.b32.xlu1 %v581_v44, %s2911_s3 }
 0xb07   :  { %v3100_v45 = vpop.permute.xlu1 %583 }
 0xb08   :  { %2461 = vmatmul.mubr.msk.f32.vlgmr.msra.gmra.mrb[6].mxu0 %vm183_vm2, %v3100_v45 }
 0xb09   :  { %2666 = vmatpush3.bf16.msra.mxu0 %v2984_v8  ;;  %2482 = vmatprep.mubr.msk.f32.mxu0 %vm2908_vm1, %v2909_v16 }
 0xb0a   :  { %2667 = vmatprep.subr.bf16.mxu0 %v2907_v10 }
 0xb0d   :  { %2669 = vmatpush3.bf16.msra.mxu0 %v3008_v15 }
 0xb0e   :  { %2677 = vmatprep.subr.bf16.mxu0 %v2676_v18 }
 0xbdb   :  { %v653_v47 = vpop.f32.mrb[6].mxu0 }
 0xbdc   :  { %v657_v48 = vadd.f32 %v653_v47, %v165_v46  ;;  %v2462_v49 = vpop.f32.mrb[7].mxu0 }
 0xbdd   :  { %v986_v49 = vld [vmem:[%s3460_s5] sm:$0xff] }
 0xbde   :  { %2779 = vtanh.f32 %v657_v48  ;;  %v2231_v51 = vmul.f32 -1.442695, %v657_v48 }
 0xbe0   :  { %2781 = vpow2.f32 %v2231_v51 }
 0xbe8   :  { %v2780_v50 = vpop.eup %2779 }
 0xbe9   :  { %667 = vrot.lane.b32.xlu0 %v2780_v50, %s2910_s12  ;;  %v987_v50 = vld [vmem:[%s3460_s5 + $0x8] sm:$0xff] }
 0xbea   :  { %v2782_v52 = vpop.eup %2781  ;;  %v3176_v51 = vpack.c.bf16 %v987_v50, %v986_v49 }
 0xbeb   :  { %v661_v53 = vadd.f32 1.0, %v2782_v52  ;;  %v988_v52 = vld [vmem:[%s3460_s5 + $0x10] sm:$0xff] }
 0xbed   :  { %2783 = vrcp.f32 %v661_v53  ;;  %v989_v53 = vld [vmem:[%s3460_s5 + $0x18] sm:$0xff] }
 0xbf7   :  { %v2784_v54 = vpop.eup %2783 }
 0xbf8   :  { %v665_v57 = vmul.f32 %v2784_v54, %v575_v40 }
 0xc5b   :  { %v668_v55 = vpop.permute.xlu0 %667 }
 0xc5c   :  { %v670_v56 = vmul.f32 %v2784_v54, %v668_v55 }
 0xc5e   :  { %672 = vrot.lane.b32.xlu1 %v670_v56, %s2910_s12 }
 0xcd0   :  { %v673_v58 = vpop.permute.xlu1 %672 }
 0xcd1   :  { %v675_v19 = vadd.f32 %v673_v58, %v665_v57  ;;  %v180_v58 = vadd.f32 %v3036_v22, %v3034_v21 }
 0xcd3   :  { %2785 = vtanh.f32 %v675_v19 }
 0xcdd   :  { %v2786_v59 = vpop.eup %2785 }
 0xcde   :  { %678 = vrot.lane.b32.xlu0 %v2786_v59, %s2910_s12 }
 0xd50   :  { %v679_v60 = vpop.permute.xlu0 %678 }
 0xd51   :  { %v681_v61 = vmul.f32 %v2784_v54, %v679_v60  ;;  %v3186_v54 = vpack.c.bf16 %v989_v53, %v988_v52 }
 0xd53   :  { %683 = vrot.lane.b32.xlu1 %v681_v61, %s2911_s3  ;;  %v3211_v61 = vld [vmem:[%s3461_s6] ss:$0 sm:$0xff] }
 0xdc5   :  { %v684_v62 = vpop.permute.xlu1 %683 }
 0xdc6   :  { %2472 = vmatmul.mubr.msk.f32.vlgmr.msra.gmra.mrb[10].mxu1 %vm183_vm2, %v684_v62 }
 0xdc7   :  { %2672 = vmatpush3.bf16.msra.mxu1 %v2984_v8  ;;  %2493 = vmatprep.mubr.msk.f32.mxu1 %vm2908_vm1, %v2909_v16 }
 0xdc8   :  { %2673 = vmatprep.subr.bf16.mxu1 %v2907_v10 }
 0xdcb   :  { %2675 = vmatpush3.bf16.msra.mxu1 %v3008_v15 }
 0xdcc   :  { %2684 = vmatprep.subr.bf16.mxu1 %v2907_v10 }
 0xe99   :  { %v753_v1 = vpop.f32.mrb[10].mxu1 }
 0xe9a   :  { %v757_v2 = vadd.f32 %v753_v1, %v170_v0  ;;  %v2473_v3 = vpop.f32.mrb[11].mxu1 }
 0xe9c   :  { %2787 = vtanh.f32 %v757_v2  ;;  %v2233_v8 = vmul.f32 -1.442695, %v757_v2 }
 0xe9e   :  { %2789 = vpow2.f32 %v2233_v8 }
 0xea6   :  { %v2788_v4 = vpop.eup %2787 }
 0xea7   :  { %767 = vrot.lane.b32.xlu0 %v2788_v4, %s2910_s12 }
 0xea8   :  { %v2790_v5 = vpop.eup %2789 }
 0xea9   :  { %v761_v6 = vadd.f32 1.0, %v2790_v5 }
 0xeab   :  { %2791 = vrcp.f32 %v761_v6 }
 0xeb5   :  { %v2792_v7 = vpop.eup %2791 }
 0xeb6   :  { %v765_v11 = vmul.f32 %v2792_v7, %v675_v19 }
 0xf19   :  { %v768_v9 = vpop.permute.xlu0 %767 }
 0xf1a   :  { %v770_v15 = vmul.f32 %v2792_v7, %v768_v9 }
 0xf1c   :  { %772 = vrot.lane.b32.xlu1 %v770_v15, %s2910_s12 }
 0xf8e   :  { %v773_v12 = vpop.permute.xlu1 %772 }
 0xf8f   :  { %v775_v17 = vadd.f32 %v773_v12, %v765_v11 }
 0xf91   :  { %2793 = vtanh.f32 %v775_v17 }
 0xf9b   :  { %v2794_v20 = vpop.eup %2793 }
 0xf9c   :  { %778 = vrot.lane.b32.xlu0 %v2794_v20, %s2910_s12 }
0x100e   :  { %v779_v24 = vpop.permute.xlu0 %778 }
0x100f   :  { %v781_v25 = vmul.f32 %v2792_v7, %v779_v24 }
0x1011   :  { %783 = vrot.lane.b32.xlu1 %v781_v25, %s2911_s3 }
0x1083   :  { %v784_v30 = vpop.permute.xlu1 %783 }
0x1084   :  { %2483 = vmatmul.mubr.msk.f32.vlgmr.msra.gmra.mrb[8].mxu0 %vm183_vm2, %v784_v30 }
0x1085   :  { %2679 = vmatpush3.bf16.msra.mxu0 %v2676_v18  ;;  %2504 = vmatprep.mubr.msk.f32.mxu0 %vm183_vm2, %v3045_v41  ;;  %v175_v41 = vadd.f32 %v3034_v21, %v3038_v23 }
0x1086   :  { %2681 = vmatprep.subr.bf16.mxu0 %v2680_v29 }
0x1089   :  { %2683 = vmatpush3.bf16.msra.mxu0 %v2680_v29 }
0x108a   :  { %2696 = vmatprep.subr.bf16.mxu0 %v2907_v10 }
0x108c   :  { %2505 = vmatmul.mubr.msk.f32.vlgmr.msra.gmra.mrb[10].mxu0 %vm183_vm2, %v3070_v63 }
0x108d   :  { %2507 = vmatprep.mubr.msk.f32.mxu0 %vm183_vm2, %v3085_v26  ;;  %2698 = vmatpush3.bf16.msra.mxu0 %v3176_v51 }
0x108e   :  { %2699 = vmatprep.subr.bf16.mxu0 %v2907_v10 }
0x1090   :  { %2508 = vmatmul.mubr.msk.f32.gmra.mrb[12].mxu0 %vm183_vm2, %v3100_v45 }
0x1091   :  { %2510 = vmatprep.mubr.msk.f32.mxu0 %vm183_vm2, %v684_v62  ;;  %2701 = vmatpush3.bf16.msra.mxu0 %v3186_v54 }
0x1092   :  { %2708 = vmatprep.subr.bf16.mxu0 %v2907_v10 }
0x1094   :  { %2511 = vmatmul.mubr.msk.f32.gmra.mrb[14].mxu0 %vm183_vm2, %v784_v30 }
0x1157   :  { %v853_v31 = vpop.f32.mrb[8].mxu0 }
0x1158   :  { %v857_v32 = vadd.f32 %v853_v31, %v175_v41  ;;  %v2484_v33 = vpop.f32.mrb[9].mxu0 }
0x115a   :  { %2795 = vtanh.f32 %v857_v32  ;;  %v2235_v39 = vmul.f32 -1.442695, %v857_v32 }
0x115c   :  { %2797 = vpow2.f32 %v2235_v39 }
0x115f   :  { %v3154_v34 = vpop.f32.mrb[10].mxu0 }
0x1160   :  { %v1068_v63 = vpop.f32.mrb[11].mxu0 }
0x1161   :  { %v1069_v62 = vadd.f32 %v3211_v61, %v1068_v63  ;;  %v1074_v63 = vadd.f32 %v3154_v34, %v3211_v61 }
0x1163   :  { %v3156_v35 = vpop.f32.mrb[12].mxu0 }
0x1164   :  { %v2796_v26 = vpop.eup %2795  ;;  %v3158_v36 = vpop.f32.mrb[13].mxu0 }
0x1165   :  { %867 = vrot.lane.b32.xlu0 %v2796_v26, %s2910_s12 }
0x1166   :  { %v2798_v23 = vpop.eup %2797 }
0x1167   :  { %v3161_v37 = vpop.f32.mrb[14].mxu0  ;;  %v861_v40 = vadd.f32 1.0, %v2798_v23 }
0x1168   :  { %v3163_v38 = vpop.f32.mrb[15].mxu0 }
0x1169   :  { %2799 = vrcp.f32 %v861_v40 }
0x1173   :  { %v2800_v42 = vpop.eup %2799 }
0x1174   :  { %v865_v45 = vmul.f32 %v2800_v42, %v775_v17 }
0x11d7   :  { %v868_v43 = vpop.permute.xlu0 %867 }
0x11d8   :  { %v870_v44 = vmul.f32 %v2800_v42, %v868_v43 }
0x11da   :  { %872 = vrot.lane.b32.xlu1 %v870_v44, %s2910_s12 }
0x124c   :  { %v873_v46 = vpop.permute.xlu1 %872 }
0x124d   :  { %v3166_v47 = vadd.f32 %v873_v46, %v865_v45 }
0x124f   :  { %2801 = vtanh.f32 %v3166_v47 }
0x1259   :  { %v2802_v48 = vpop.eup %2801 }
0x125a   :  { %878 = vrot.lane.b32.xlu0 %v2802_v48, %s2910_s12 }
0x12cc   :  { %v879_v55 = vpop.permute.xlu0 %878 }
0x12cd   :  { %v881_v56 = vmul.f32 %v2800_v42, %v879_v55 }
0x12cf   :  { %883 = vrot.lane.b32.xlu1 %v881_v56, %s2911_s3 }
0x1341   :  { %v884_v57 = vpop.permute.xlu1 %883 }
0x1342   :  { %2494 = vmatmul.mubr.msk.f32.vlgmr.msra.gmra.mrb[12].mxu1 %vm183_vm2, %v884_v57  ;;  %2513 = vmatprep.mubr.msk.f32.mxu0 %vm183_vm2, %v884_v57 }
0x1343   :  { %2686 = vmatpush3.bf16.msra.mxu1 %v3176_v51  ;;  %2524 = vmatprep.mubr.msk.f32.mxu1 %vm2908_vm1, %v2909_v16 }
0x1344   :  { %2687 = vmatprep.subr.bf16.mxu1 %v2907_v10 }
0x1347   :  { %2689 = vmatpush3.bf16.msra.mxu1 %v3186_v54 }
0x1348   :  { %2690 = vmatprep.subr.bf16.mxu1 %v2907_v10 }
0x134a   :  { %2525 = vmatmul.mubr.f32.vlgmr.msra.gmra.mrb[14].mxu1 %v2909_v16 }
0x134b   :  { %2692 = vmatpush3.bf16.msra.mxu1 %v3176_v51  ;;  %2535 = vmatprep.mubr.msk.f32.mxu1 %vm2908_vm1, %v2909_v16 }
0x134c   :  { %2693 = vmatprep.subr.bf16.mxu1 %v2907_v10 }
0x134f   :  { %2695 = vmatpush3.bf16.msra.mxu1 %v3186_v54 }
0x1350   :  { %2702 = vmatprep.subr.bf16.mxu1 %v2907_v10 }
0x1415   :  { %v953_v19 = vpop.f32.mrb[12].mxu1 }
0x1416   :  { %v957_v59 = vadd.f32 %v953_v19, %v180_v58  ;;  %v2495_v60 = vpop.f32.mrb[13].mxu1  ;;  %v1079_v19 = vadd.f32 %v3211_v61, %v3158_v36 }
0x1418   :  { %v2237_v17 = vmul.f32 -1.442695, %v957_v59 }
0x141d   :  { %v1173_v0 = vpop.f32.mrb[14].mxu1 }
0x141e   :  { %v1177_v1 = vadd.f32 %v1173_v0, %v1069_v62  ;;  %v2526_v2 = vpop.f32.mrb[15].mxu1 }
0x1420   :  { %2803 = vtanh.f32 %v1177_v1  ;;  %v2247_v4 = vmul.f32 -1.442695, %v1177_v1 }
0x1422   :  { %2805 = vpow2.f32 %v2247_v4 }
0x142a   :  { %v2804_v3 = vpop.eup %2803 }
0x142b   :  { %1187 = vrot.lane.b32.xlu0 %v2804_v3, %s2910_s12 }
0x142c   :  { %v2806_v21 = vpop.eup %2805 }
0x142d   :  { %v1181_v22 = vadd.f32 1.0, %v2806_v21 }
0x142f   :  { %2807 = vrcp.f32 %v1181_v22 }
0x1439   :  { %v2808_v8 = vpop.eup %2807 }
0x143a   :  { %v1185_v7 = vmul.f32 0.0, %v2808_v8 }
0x149d   :  { %v1188_v5 = vpop.permute.xlu0 %1187 }
0x149e   :  { %v1190_v6 = vmul.f32 %v2808_v8, %v1188_v5 }
0x14a0   :  { %1192 = vrot.lane.b32.xlu1 %v1190_v6, %s2910_s12 }
0x1512   :  { %v1193_v9 = vpop.permute.xlu1 %1192 }
0x1513   :  { %v1195_v15 = vadd.f32 %v1193_v9, %v1185_v7 }
0x1515   :  { %2809 = vtanh.f32 %v1195_v15 }
0x1516   :  { %2811 = vtanh.f32 %v957_v59 }
0x1517   :  { %2813 = vpow2.f32 %v2237_v17 }
0x151f   :  { %v2810_v11 = vpop.eup %2809 }
0x1520   :  { %1198 = vrot.lane.b32.xlu0 %v2810_v11, %s2910_s12  ;;  %v2812_v12 = vpop.eup %2811  ;;  %v1084_v11 = vadd.f32 %v3156_v35, %v3211_v61 }
0x1521   :  { %v2814_v13 = vpop.eup %2813 }
0x1522   :  { %v961_v14 = vadd.f32 1.0, %v2814_v13 }
0x1524   :  { %967 = vrot.lane.b32.xlu0 %v2812_v12, %s2910_s12  ;;  %2815 = vrcp.f32 %v961_v14 }
0x152e   :  { %v2816_v24 = vpop.eup %2815 }
0x152f   :  { %v965_v29 = vmul.f32 %v2816_v24, %v3166_v47 }
0x1592   :  { %v1199_v18 = vpop.permute.xlu0 %1198 }
0x1593   :  { %v1201_v20 = vmul.f32 %v2808_v8, %v1199_v18 }
0x1595   :  { %1203 = vrot.lane.b32.xlu1 %v1201_v20, %s2911_s3 }
0x1596   :  { %v968_v25 = vpop.permute.xlu0 %967 }
0x1597   :  { %v970_v27 = vmul.f32 %v2816_v24, %v968_v25 }
0x1599   :  { %972 = vrot.lane.b32.xlu0 %v970_v27, %s2910_s12 }
0x1607   :  { %v3220_v28 = vpop.permute.xlu1 %1203 }
0x1608   :  { %2536 = vmatmul.mubr.msk.f32.vlgmr.msra.gmra.mrb[16].mxu1 %vm183_vm2, %v3220_v28 }
0x1609   :  { %2704 = vmatpush3.bf16.msra.mxu1 %v3176_v51  ;;  %2557 = vmatprep.mubr.msk.f32.mxu1 %vm2908_vm1, %v2909_v16 }
0x160a   :  { %2705 = vmatprep.subr.bf16.mxu1 %v2907_v10 }
0x160b   :  { %v973_v30 = vpop.permute.xlu0 %972 }
0x160c   :  { %v975_v41 = vadd.f32 %v973_v30, %v965_v29 }
0x160d   :  { %2707 = vmatpush3.bf16.msra.mxu1 %v3186_v54 }
0x160e   :  { %2817 = vtanh.f32 %v975_v41  ;;  %2714 = vmatprep.subr.bf16.mxu1 %v2907_v10 }
0x1618   :  { %v2818_v31 = vpop.eup %2817 }
0x1619   :  { %978 = vrot.lane.b32.xlu0 %v2818_v31, %s2910_s12 }
0x168b   :  { %v979_v32 = vpop.permute.xlu0 %978 }
0x168c   :  { %v981_v33 = vmul.f32 %v2816_v24, %v979_v32 }
0x168e   :  { %998 = vrot.lane.b32.xlu0 %v981_v33, %s2911_s3 }
0x16db   :  { %v1273_v26 = vpop.f32.mrb[16].mxu1 }
0x16dc   :  { %v1277_v39 = vadd.f32 %v1273_v26, %v1074_v63  ;;  %v2537_v23 = vpop.f32.mrb[17].mxu1  ;;  %v1089_v26 = vadd.f32 %v3211_v61, %v3163_v38 }
0x16de   :  { %2819 = vtanh.f32 %v1277_v39  ;;  %v2249_v43 = vmul.f32 -1.442695, %v1277_v39 }
0x16e0   :  { %2821 = vpow2.f32 %v2249_v43 }
0x16e8   :  { %v2820_v40 = vpop.eup %2819 }
0x16e9   :  { %1287 = vrot.lane.b32.xlu1 %v2820_v40, %s2910_s12 }
0x16ea   :  { %v2822_v44 = vpop.eup %2821 }
0x16eb   :  { %v1281_v45 = vadd.f32 1.0, %v2822_v44 }
0x16ed   :  { %2823 = vrcp.f32 %v1281_v45 }
0x16f7   :  { %v2824_v46 = vpop.eup %2823 }
0x16f8   :  { %v1285_v48 = vmul.f32 %v2824_v46, %v1195_v15 }
0x1700   :  { %v999_v42 = vpop.permute.xlu0 %998 }
0x1701   :  { %2514 = vmatmul.mubr.msk.f32.gmra.mrb[16].mxu0 %vm183_vm2, %v999_v42 }
0x1702   :  { %2546 = vmatprep.mubr.msk.f32.mxu0 %vm2908_vm1, %v2909_v16 }
0x175b   :  { %v1288_v34 = vpop.permute.xlu1 %1287 }
0x175c   :  { %v1290_v47 = vmul.f32 %v2824_v46, %v1288_v34 }
0x175e   :  { %1292 = vrot.lane.b32.xlu1 %v1290_v47, %s2910_s12 }
0x17d0   :  { %v1293_v49 = vpop.permute.xlu1 %1292 }
0x17d1   :  { %v1295_v50 = vadd.f32 %v1293_v49, %v1285_v48 }
0x17d3   :  { %2825 = vtanh.f32 %v1295_v50 }
0x17d4   :  { %v3240_v52 = vpop.f32.mrb[16].mxu0 }
0x17d5   :  { %v3242_v53 = vpop.f32.mrb[17].mxu0 }
0x17dd   :  { %v2826_v55 = vpop.eup %2825 }
0x17de   :  { %1298 = vrot.lane.b32.xlu1 %v2826_v55, %s2910_s12 }
0x1850   :  { %v1299_v56 = vpop.permute.xlu1 %1298 }
0x1851   :  { %v1301_v57 = vmul.f32 %v2824_v46, %v1299_v56 }
0x1853   :  { %1303 = vrot.lane.b32.xlu1 %v1301_v57, %s2911_s3 }
0x18c5   :  { %v3246_v58 = vpop.permute.xlu1 %1303 }
0x18c6   :  { %2547 = vmatmul.mubr.msk.f32.vlgmr.msra.gmra.mrb[18].mxu0 %vm183_vm2, %v3246_v58 }
0x18c7   :  { %2710 = vmatpush3.bf16.msra.mxu0 %v3176_v51  ;;  %2568 = vmatprep.mubr.msk.f32.mxu0 %vm2908_vm1, %v2909_v16 }
0x18c8   :  { %2711 = vmatprep.subr.bf16.mxu0 %v2907_v10 }
0x18cb   :  { %2713 = vmatpush3.bf16.msra.mxu0 %v3186_v54 }
0x18cc   :  { %2720 = vmatprep.subr.bf16.mxu0 %v2907_v10 }
0x1999   :  { %v1373_v59 = vpop.f32.mrb[18].mxu0 }
0x199a   :  { %v1377_v60 = vadd.f32 %v1373_v59, %v1079_v19  ;;  %v2548_v62 = vpop.f32.mrb[19].mxu0  ;;  %v1094_v19 = vadd.f32 %v3161_v37, %v3211_v61 }
0x199c   :  { %2827 = vtanh.f32 %v1377_v60  ;;  %v2251_v1 = vmul.f32 -1.442695, %v1377_v60 }
0x199e   :  { %2829 = vpow2.f32 %v2251_v1 }
0x19a6   :  { %v2828_v0 = vpop.eup %2827 }
0x19a7   :  { %1387 = vrot.lane.b32.xlu0 %v2828_v0, %s2910_s12 }
0x19a8   :  { %v2830_v2 = vpop.eup %2829 }
0x19a9   :  { %v1381_v3 = vadd.f32 1.0, %v2830_v2 }
0x19ab   :  { %2831 = vrcp.f32 %v1381_v3 }
0x19b5   :  { %v2832_v4 = vpop.eup %2831 }
0x19b6   :  { %v1385_v8 = vmul.f32 %v2832_v4, %v1295_v50 }
0x1a19   :  { %v1388_v21 = vpop.permute.xlu0 %1387 }
0x1a1a   :  { %v1390_v22 = vmul.f32 %v2832_v4, %v1388_v21  ;;  %v1902_v21 = vld [vmem:[%s3462_s7] sm:$0xff] }
0x1a1c   :  { %1392 = vrot.lane.b32.xlu1 %v1390_v22, %s2910_s12  ;;  %v1903_v22 = vld [vmem:[%s3462_s7 + $0x8] sm:$0xff] }
0x1a8e   :  { %v1393_v5 = vpop.permute.xlu1 %1392 }
0x1a8f   :  { %v1395_v36 = vadd.f32 %v1393_v5, %v1385_v8  ;;  %v2732_v8 = vpack.c.bf16 %v1903_v22, %v1902_v21 }
0x1a91   :  { %2833 = vtanh.f32 %v1395_v36 }
0x1a9b   :  { %v2834_v6 = vpop.eup %2833 }
0x1a9c   :  { %1398 = vrot.lane.b32.xlu0 %v2834_v6, %s2910_s12 }
0x1b0e   :  { %v1399_v7 = vpop.permute.xlu0 %1398 }
0x1b0f   :  { %v1401_v9 = vmul.f32 %v2832_v4, %v1399_v7  ;;  %v1904_v7 = vld [vmem:[%s3462_s7 + $0x10] sm:$0xff] }
0x1b11   :  { %1403 = vrot.lane.b32.xlu1 %v1401_v9, %s2911_s3  ;;  %v1905_v9 = vld [vmem:[%s3462_s7 + $0x18] sm:$0xff] }
0x1b83   :  { %v3262_v15 = vpop.permute.xlu1 %1403 }
0x1b84   :  { %2558 = vmatmul.mubr.msk.f32.vlgmr.msra.gmra.mrb[18].mxu1 %vm183_vm2, %v3262_v15 }
0x1b85   :  { %2716 = vmatpush3.bf16.msra.mxu1 %v3176_v51  ;;  %2579 = vmatprep.mubr.msk.f32.mxu1 %vm2908_vm1, %v2909_v16 }
0x1b86   :  { %2717 = vmatprep.subr.bf16.mxu1 %v2907_v10 }
0x1b89   :  { %2719 = vmatpush3.bf16.msra.mxu1 %v3186_v54 }
0x1b8a   :  { %2726 = vmatprep.subr.bf16.mxu1 %v2907_v10 }
0x1c57   :  { %v1473_v12 = vpop.f32.mrb[18].mxu1 }
0x1c58   :  { %v1477_v17 = vadd.f32 %v1473_v12, %v1084_v11  ;;  %v2559_v13 = vpop.f32.mrb[19].mxu1  ;;  %v2736_v11 = vpack.c.bf16 %v1905_v9, %v1904_v7 }
0x1c5a   :  { %2835 = vtanh.f32 %v1477_v17  ;;  %v2253_v18 = vmul.f32 -1.442695, %v1477_v17  ;;  %v1099_v17 = vadd.f32 %v3211_v61, %v3242_v53 }
0x1c5c   :  { %2837 = vpow2.f32 %v2253_v18 }
0x1c64   :  { %v2836_v14 = vpop.eup %2835 }
0x1c65   :  { %1487 = vrot.lane.b32.xlu0 %v2836_v14, %s2910_s12 }
0x1c66   :  { %v2838_v20 = vpop.eup %2837 }
0x1c67   :  { %v1481_v24 = vadd.f32 1.0, %v2838_v20 }
0x1c69   :  { %2839 = vrcp.f32 %v1481_v24 }
0x1c73   :  { %v2840_v25 = vpop.eup %2839 }
0x1c74   :  { %v1485_v30 = vmul.f32 %v2840_v25, %v1395_v36 }
0x1cd7   :  { %v1488_v27 = vpop.permute.xlu0 %1487 }
0x1cd8   :  { %v1490_v29 = vmul.f32 %v2840_v25, %v1488_v27 }
0x1cda   :  { %1492 = vrot.lane.b32.xlu1 %v1490_v29, %s2910_s12 }
0x1d4c   :  { %v1493_v41 = vpop.permute.xlu1 %1492 }
0x1d4d   :  { %v1495_v35 = vadd.f32 %v1493_v41, %v1485_v30 }
0x1d4f   :  { %2841 = vtanh.f32 %v1495_v35 }
0x1d59   :  { %v2842_v31 = vpop.eup %2841 }
0x1d5a   :  { %1498 = vrot.lane.b32.xlu0 %v2842_v31, %s2910_s12 }
0x1dcc   :  { %v1499_v32 = vpop.permute.xlu0 %1498 }
0x1dcd   :  { %v1501_v33 = vmul.f32 %v2840_v25, %v1499_v32 }
0x1dcf   :  { %1503 = vrot.lane.b32.xlu1 %v1501_v33, %s2911_s3 }
0x1e41   :  { %v3278_v63 = vpop.permute.xlu1 %1503 }
0x1e42   :  { %2569 = vmatmul.mubr.msk.f32.vlgmr.msra.gmra.mrb[20].mxu0 %vm183_vm2, %v3278_v63 }
0x1e43   :  { %2722 = vmatpush3.bf16.msra.mxu0 %v3176_v51  ;;  %2590 = vmatprep.mubr.msk.f32.mxu0 %vm2908_vm1, %v2909_v16 }
0x1e44   :  { %2723 = vmatprep.subr.bf16.mxu0 %v2907_v10 }
0x1e47   :  { %2725 = vmatpush3.bf16.msra.mxu0 %v3186_v54 }
0x1e48   :  { %2733 = vmatprep.subr.bf16.mxu0 %v2732_v8 }
0x1f15   :  { %v1573_v39 = vpop.f32.mrb[20].mxu0 }
0x1f16   :  { %v1577_v23 = vadd.f32 %v1573_v39, %v1089_v26  ;;  %v2570_v40 = vpop.f32.mrb[21].mxu0 }
0x1f18   :  { %2843 = vtanh.f32 %v1577_v23  ;;  %v2255_v43 = vmul.f32 -1.442695, %v1577_v23 }
0x1f1a   :  { %2845 = vpow2.f32 %v2255_v43 }
0x1f22   :  { %v2844_v42 = vpop.eup %2843 }
0x1f23   :  { %1587 = vrot.lane.b32.xlu0 %v2844_v42, %s2910_s12 }
0x1f24   :  { %v2846_v44 = vpop.eup %2845 }
0x1f25   :  { %v1581_v45 = vadd.f32 1.0, %v2846_v44 }
0x1f27   :  { %2847 = vrcp.f32 %v1581_v45 }
0x1f31   :  { %v2848_v46 = vpop.eup %2847 }
0x1f32   :  { %v1585_v48 = vmul.f32 %v2848_v46, %v1495_v35 }
0x1f95   :  { %v1588_v34 = vpop.permute.xlu0 %1587 }
0x1f96   :  { %v1590_v47 = vmul.f32 %v2848_v46, %v1588_v34 }
0x1f98   :  { %1592 = vrot.lane.b32.xlu1 %v1590_v47, %s2910_s12 }
0x200a   :  { %v1593_v49 = vpop.permute.xlu1 %1592 }
0x200b   :  { %v1595_v38 = vadd.f32 %v1593_v49, %v1585_v48 }
0x200d   :  { %2849 = vtanh.f32 %v1595_v38 }
0x2017   :  { %v2850_v50 = vpop.eup %2849 }
0x2018   :  { %1598 = vrot.lane.b32.xlu0 %v2850_v50, %s2910_s12 }
0x208a   :  { %v1599_v55 = vpop.permute.xlu0 %1598 }
0x208b   :  { %v1601_v56 = vmul.f32 %v2848_v46, %v1599_v55 }
0x208d   :  { %1603 = vrot.lane.b32.xlu1 %v1601_v56, %s2911_s3 }
0x20ff   :  { %v1604_v57 = vpop.permute.xlu1 %1603 }
0x2100   :  { %2580 = vmatmul.mubr.msk.f32.vlgmr.msra.gmra.mrb[20].mxu1 %vm183_vm2, %v1604_v57 }
0x2101   :  { %2728 = vmatpush3.bf16.msra.mxu1 %v3176_v51  ;;  %2601 = vmatprep.mubr.msk.f32.mxu1 %vm2908_vm1, %v2909_v16 }
0x2102   :  { %2729 = vmatprep.subr.bf16.mxu1 %v2907_v10 }
0x2105   :  { %2731 = vmatpush3.bf16.msra.mxu1 %v3186_v54 }
0x21d3   :  { %v1673_v59 = vpop.f32.mrb[20].mxu1 }
0x21d4   :  { %v1677_v60 = vadd.f32 %v1673_v59, %v1094_v19  ;;  %v2581_v62 = vpop.f32.mrb[21].mxu1 }
0x21d6   :  { %2851 = vtanh.f32 %v1677_v60  ;;  %v2257_v1 = vmul.f32 -1.442695, %v1677_v60 }
0x21d8   :  { %2853 = vpow2.f32 %v2257_v1 }
0x21e0   :  { %v2852_v0 = vpop.eup %2851 }
0x21e1   :  { %1687 = vrot.lane.b32.xlu0 %v2852_v0, %s2910_s12 }
0x21e2   :  { %v2854_v51 = vpop.eup %2853 }
0x21e3   :  { %v1681_v2 = vadd.f32 1.0, %v2854_v51 }
0x21e5   :  { %2855 = vrcp.f32 %v1681_v2 }
0x21ef   :  { %v2856_v16 = vpop.eup %2855 }
0x21f0   :  { %v1685_v54 = vmul.f32 %v2856_v16, %v1595_v38 }
0x2253   :  { %v1688_v3 = vpop.permute.xlu0 %1687 }
0x2254   :  { %v1690_v10 = vmul.f32 %v2856_v16, %v1688_v3 }
0x2256   :  { %1692 = vrot.lane.b32.xlu1 %v1690_v10, %s2910_s12 }
0x22c8   :  { %v1693_v4 = vpop.permute.xlu1 %1692 }
0x22c9   :  { %v3303_v37 = vadd.f32 %v1693_v4, %v1685_v54 }
0x22cb   :  { %2857 = vtanh.f32 %v3303_v37 }
0x22d5   :  { %v2858_v5 = vpop.eup %2857 }
0x22d6   :  { %1698 = vrot.lane.b32.xlu0 %v2858_v5, %s2910_s12 }
0x2348   :  { %v1699_v36 = vpop.permute.xlu0 %1698 }
0x2349   :  { %v1701_v6 = vmul.f32 %v2856_v16, %v1699_v36 }
0x234b   :  { %1703 = vrot.lane.b32.xlu1 %v1701_v6, %s2911_s3 }
0x23bd   :  { %v1704_v12 = vpop.permute.xlu1 %1703 }
0x23be   :  { %2591 = vmatmul.mubr.msk.f32.vlgmr.msra.gmra.mrb[22].mxu0 %vm183_vm2, %v1704_v12 }
0x23bf   :  { %2735 = vmatpush3.bf16.msra.mxu0 %v2732_v8  ;;  %2612 = vmatprep.mubr.msk.f32.mxu0 %vm183_vm2, %v3220_v28  ;;  %v2023_v28 = vlaneseq }
0x23c0   :  { %2737 = vmatprep.subr.bf16.mxu0 %v2736_v11 }
0x23c3   :  { %2739 = vmatpush3.bf16.msra.mxu0 %v2736_v11 }
0x23c6   :  { %2613 = vmatmul.mubr.msk.f32.vlgmr.msra.gmra.mrb[24].mxu0 %vm183_vm2, %v3246_v58  ;;  %v3336_v58 = vshrl.u32 %v2023_v28, 7 }
0x23c7   :  { %2615 = vmatprep.mubr.msk.f32.mxu0 %vm183_vm2, %v3262_v15  ;;  %v3341_v15 = vld [vmem:[%s3463_s8] ss:$0 sm:$0xff] }
0x23c8   :  { %vm2025_vm3 = vcmp.lt.s32.totalorder %v3336_v58, 4 }
0x23ca   :  { %2616 = vmatmul.mubr.msk.f32.gmra.mrb[26].mxu0 %vm183_vm2, %v3278_v63 }
0x23cb   :  { %2618 = vmatprep.mubr.msk.f32.mxu0 %vm183_vm2, %v1604_v57 }
0x23ce   :  { %2619 = vmatmul.mubr.msk.f32.gmra.mrb[28].mxu0 %vm183_vm2, %v1704_v12 }
0x2491   :  { %v1773_v13 = vpop.f32.mrb[22].mxu0 }
0x2492   :  { %v3333_v14 = vadd.f32 %v1773_v13, %v1099_v17  ;;  %v2592_v18 = vpop.f32.mrb[23].mxu0 }
0x2494   :  { %2859 = vtanh.f32 %v3333_v14 }
0x2499   :  { %v2614_v20 = vpop.f32.mrb[24].mxu0 }
0x249a   :  { %v1990_v24 = vadd.f32 %v2614_v20, %v3341_v15  ;;  %v1984_v53 = vpop.f32.mrb[25].mxu0 }
0x249b   :  { %v1985_v25 = vadd.f32 %v3341_v15, %v1984_v53 }
0x249c   :  { %v2049_v27 = vsel %vm2025_vm3, %v1990_v24, -1e+30 }
0x249d   :  { %v2050_v29 = vsel %vm2027_vm4, %v2049_v27, -inf  ;;  %v2026_v30 = vsel %vm2025_vm3, %v1985_v25, -1e+30  ;;  %v2617_v41 = vpop.f32.mrb[26].mxu0 }
0x249e   :  { %v2860_v35 = vpop.eup %2859  ;;  %v2051_v31 = vrot.slane %v2050_v29, 4  ;;  %v2028_v32 = vsel %vm2027_vm4, %v2026_v30, -inf  ;;  %v2000_v33 = vadd.f32 %v2617_v41, %v3341_v15  ;;  %v1994_v63 = vpop.f32.mrb[27].mxu0 }
0x249f   :  { %v2029_v26 = vrot.slane %v2028_v32, 4  ;;  %v1995_v39 = vadd.f32 %v3341_v15, %v1994_v63  ;;  %1787 = vrot.lane.b32.xlu0 %v2860_v35, %s2910_s12 }
0x24a0   :  { %v2052_v23 = vmax.f32 %v2050_v29, %v2051_v31  ;;  %v2095_v40 = vsel %vm2025_vm3, %v2000_v33, -1e+30 }
0x24a1   :  { %v2030_v42 = vmax.f32 %v2028_v32, %v2029_v26  ;;  %v2096_v43 = vsel %vm2027_vm4, %v2095_v40, -inf  ;;  %v2072_v44 = vsel %vm2025_vm3, %v1995_v39, -1e+30  ;;  %v2620_v45 = vpop.f32.mrb[28].mxu0 }
0x24a2   :  { %v2053_v46 = vrot.slane %v2052_v23, 2  ;;  %v2097_v34 = vrot.slane %v2096_v43, 4  ;;  %v2073_v47 = vsel %vm2027_vm4, %v2072_v44, -inf  ;;  %v2010_v48 = vadd.f32 %v2620_v45, %v3341_v15  ;;  %v2004_v49 = vpop.f32.mrb[29].mxu0 }
0x24a3   :  { %v2031_v38 = vrot.slane %v2030_v42, 2  ;;  %v2074_v50 = vrot.slane %v2073_v47, 4  ;;  %v2005_v55 = vadd.f32 %v3341_v15, %v2004_v49 }
0x24a4   :  { %v2054_v56 = vmax.f32 %v2052_v23, %v2053_v46  ;;  %v2098_v57 = vmax.f32 %v2096_v43, %v2097_v34  ;;  %v2141_v19 = vsel %vm2025_vm3, %v2010_v48, -1e+30 }
0x24a5   :  { %v2032_v59 = vmax.f32 %v2030_v42, %v2031_v38  ;;  %v2075_v60 = vmax.f32 %v2073_v47, %v2074_v50  ;;  %v2142_v62 = vsel %vm2027_vm4, %v2141_v19, -inf  ;;  %v2118_v0 = vsel %vm2025_vm3, %v2005_v55, -1e+30 }
0x24a6   :  { %v2055_v1 = vrot.slane %v2054_v56, 1  ;;  %v2099_v51 = vrot.slane %v2098_v57, 2  ;;  %v2143_v2 = vrot.slane %v2142_v62, 4  ;;  %v2119_v16 = vsel %vm2027_vm4, %v2118_v0, -inf }
0x24a7   :  { %v2033_v3 = vrot.slane %v2032_v59, 1  ;;  %v2076_v10 = vrot.slane %v2075_v60, 2  ;;  %v2120_v54 = vrot.slane %v2119_v16, 4 }
0x24a8   :  { %v2056_v4 = vmax.f32 %v2054_v56, %v2055_v1  ;;  %v2100_v21 = vmax.f32 %v2098_v57, %v2099_v51  ;;  %v2144_v22 = vmax.f32 %v2142_v62, %v2143_v2 }
0x24a9   :  { %v2034_v8 = vmax.f32 %v2032_v59, %v2033_v3  ;;  %v2077_v5 = vmax.f32 %v2075_v60, %v2076_v10  ;;  %v2121_v36 = vmax.f32 %v2119_v16, %v2120_v54 }
0x24aa   :  { %v3369_v6 = vsub.f32 %v2049_v27, %v2056_v4  ;;  %v2101_v7 = vrot.slane %v2100_v21, 1  ;;  %v2145_v9 = vrot.slane %v2144_v22, 2 }
0x24ab   :  { %v3371_v11 = vsub.f32 %v2026_v30, %v2034_v8  ;;  %v2078_v12 = vrot.slane %v2077_v5, 1  ;;  %v2122_v17 = vrot.slane %v2121_v36, 2 }
0x24ac   :  { %v2058_v13 = vmul.f32 1.442695, %v3369_v6  ;;  %v2102_v28 = vmax.f32 %v2100_v21, %v2101_v7  ;;  %v2146_v18 = vmax.f32 %v2144_v22, %v2145_v9 }
0x24ad   :  { %v2036_v20 = vmul.f32 1.442695, %v3371_v11  ;;  %v2079_v24 = vmax.f32 %v2077_v5, %v2078_v12  ;;  %v2123_v53 = vmax.f32 %v2121_v36, %v2122_v17 }
0x24ae   :  { %2861 = vpow2.f32 %v2058_v13  ;;  %v3375_v25 = vsub.f32 %v2095_v40, %v2102_v28  ;;  %v2147_v29 = vrot.slane %v2146_v18, 1 }
0x24af   :  { %2863 = vpow2.f32 %v2036_v20  ;;  %v3377_v27 = vsub.f32 %v2072_v44, %v2079_v24  ;;  %v2124_v41 = vrot.slane %v2123_v53, 1 }
0x24b0   :  { %v2104_v30 = vmul.f32 1.442695, %v3375_v25  ;;  %v2148_v35 = vmax.f32 %v2146_v18, %v2147_v29 }
0x24b1   :  { %v2081_v31 = vmul.f32 1.442695, %v3377_v27  ;;  %v2125_v32 = vmax.f32 %v2123_v53, %v2124_v41 }
0x24b2   :  { %2865 = vpow2.f32 %v2104_v30  ;;  %v3381_v33 = vsub.f32 %v2141_v19, %v2148_v35 }
0x24b3   :  { %2867 = vpow2.f32 %v2081_v31  ;;  %v3383_v63 = vsub.f32 %v2118_v0, %v2125_v32 }
0x24b4   :  { %v2150_v26 = vmul.f32 1.442695, %v3381_v33 }
0x24b5   :  { %v2127_v39 = vmul.f32 1.442695, %v3383_v63 }
0x24b6   :  { %2869 = vpow2.f32 %v2150_v26 }
0x24b7   :  { %2871 = vpow2.f32 %v2127_v39 }
0x24b8   :  { %v2862_v23 = vpop.eup %2861 }
0x24b9   :  { %v2864_v40 = vpop.eup %2863  ;;  %v2060_v42 = vsel %vm2027_vm4, %v2862_v23, 0.0 }
0x24ba   :  { %v2061_v43 = vrot.slane %v2060_v42, 4  ;;  %v2038_v44 = vsel %vm2027_vm4, %v2864_v40, 0.0 }
0x24bb   :  { %v2039_v45 = vrot.slane %v2038_v44, 4 }
0x24bc   :  { %v2866_v46 = vpop.eup %2865  ;;  %v2062_v34 = vadd.f32 %v2061_v43, %v2060_v42 }
0x24bd   :  { %v2868_v47 = vpop.eup %2867  ;;  %v2040_v48 = vadd.f32 %v2039_v45, %v2038_v44  ;;  %v2106_v49 = vsel %vm2027_vm4, %v2866_v46, 0.0 }
0x24be   :  { %v2063_v38 = vrot.slane %v2062_v34, 2  ;;  %v2107_v50 = vrot.slane %v2106_v49, 4  ;;  %v2083_v55 = vsel %vm2027_vm4, %v2868_v47, 0.0 }
0x24bf   :  { %v2041_v56 = vrot.slane %v2040_v48, 2  ;;  %v2084_v57 = vrot.slane %v2083_v55, 4 }
0x24c0   :  { %v2870_v19 = vpop.eup %2869  ;;  %v2064_v59 = vadd.f32 %v2063_v38, %v2062_v34  ;;  %v2108_v60 = vadd.f32 %v2107_v50, %v2106_v49 }
0x24c1   :  { %v2872_v62 = vpop.eup %2871  ;;  %v2042_v0 = vadd.f32 %v2041_v56, %v2040_v48  ;;  %v2085_v1 = vadd.f32 %v2084_v57, %v2083_v55  ;;  %v2152_v51 = vsel %vm2027_vm4, %v2870_v19, 0.0 }
0x24c2   :  { %v2065_v2 = vrot.slane %v2064_v59, 1  ;;  %v2109_v16 = vrot.slane %v2108_v60, 2  ;;  %v2153_v3 = vrot.slane %v2152_v51, 4  ;;  %v2129_v10 = vsel %vm2027_vm4, %v2872_v62, 0.0 }
0x24c3   :  { %v2043_v54 = vrot.slane %v2042_v0, 1  ;;  %v2086_v4 = vrot.slane %v2085_v1, 2  ;;  %v2130_v21 = vrot.slane %v2129_v10, 4 }
0x24c4   :  { %v2066_v22 = vadd.f32 %v2065_v2, %v2064_v59  ;;  %v2110_v8 = vadd.f32 %v2109_v16, %v2108_v60  ;;  %v2154_v5 = vadd.f32 %v2153_v3, %v2152_v51 }
0x24c5   :  { %v2044_v36 = vadd.f32 %v2043_v54, %v2042_v0  ;;  %v2087_v7 = vadd.f32 %v2086_v4, %v2085_v1  ;;  %v2131_v9 = vadd.f32 %v2130_v21, %v2129_v10  ;;  %v1104_v0 = vadd.f32 %v3240_v52, %v3211_v61 }
0x24c6   :  { %2873 = vlog2.f32 %v2066_v22  ;;  %v2111_v12 = vrot.slane %v2110_v8, 1  ;;  %v2155_v17 = vrot.slane %v2154_v5, 2 }
0x24c7   :  { %2875 = vlog2.f32 %v2044_v36  ;;  %v2088_v13 = vrot.slane %v2087_v7, 1  ;;  %v2132_v28 = vrot.slane %v2131_v9, 2 }
0x24c8   :  { %v2112_v18 = vadd.f32 %v2111_v12, %v2110_v8  ;;  %v2156_v20 = vadd.f32 %v2155_v17, %v2154_v5 }
0x24c9   :  { %v2089_v24 = vadd.f32 %v2088_v13, %v2087_v7  ;;  %v2133_v53 = vadd.f32 %v2132_v28, %v2131_v9 }
0x24ca   :  { %2877 = vlog2.f32 %v2112_v18  ;;  %v2157_v29 = vrot.slane %v2156_v20, 1 }
0x24cb   :  { %2879 = vlog2.f32 %v2089_v24  ;;  %v2134_v41 = vrot.slane %v2133_v53, 1 }
0x24cc   :  { %v2158_v30 = vadd.f32 %v2157_v29, %v2156_v20 }
0x24cd   :  { %v2135_v35 = vadd.f32 %v2134_v41, %v2133_v53 }
0x24ce   :  { %2881 = vlog2.f32 %v2158_v30 }
0x24cf   :  { %2883 = vlog2.f32 %v2135_v35 }
0x24d0   :  { %v2874_v31 = vpop.eup %2873 }
0x24d1   :  { %v2876_v32 = vpop.eup %2875  ;;  %v2068_v26 = vmul.f32 0.6931472, %v2874_v31 }
0x24d2   :  { %v2046_v39 = vmul.f32 0.6931472, %v2876_v32 }
0x24d3   :  { %v2069_v23 = vsub.f32 %v3369_v6, %v2068_v26 }
0x24d4   :  { %v2878_v40 = vpop.eup %2877  ;;  %v2047_v42 = vsub.f32 %v3371_v11, %v2046_v39 }
0x24d5   :  { %v2880_v43 = vpop.eup %2879  ;;  %2271 = vst.msk [vmem:[%s3464_s9 + $0x8] sm:$0xff] %vm2027_vm4, %v2069_v23  ;;  %v2114_v44 = vmul.f32 0.6931472, %v2878_v40 }
0x24d6   :  { %2048 = vst.msk [vmem:[%s3464_s9] sm:$0xff] %vm2027_vm4, %v2047_v42  ;;  %v2091_v45 = vmul.f32 0.6931472, %v2880_v43 }
0x24d7   :  { %v2115_v46 = vsub.f32 %v3375_v25, %v2114_v44 }
0x24d8   :  { %v2882_v34 = vpop.eup %2881  ;;  %v2092_v6 = vsub.f32 %v3377_v27, %v2091_v45  ;;  %v2259_v27 = vmul.f32 -1.442695, %v3333_v14 }
0x24d9   :  { %v2884_v47 = vpop.eup %2883  ;;  %2273 = vst.msk [vmem:[%s3464_s9 + $0x18] sm:$0xff] %vm2027_vm4, %v2115_v46  ;;  %v2160_v11 = vmul.f32 0.6931472, %v2882_v34 }
0x24da   :  { %2272 = vst.msk [vmem:[%s3464_s9 + $0x10] sm:$0xff] %vm2027_vm4, %v2092_v6  ;;  %v2137_v48 = vmul.f32 0.6931472, %v2884_v47  ;;  %2885 = vpow2.f32 %v2259_v27 }
0x24db   :  { %v2161_v49 = vsub.f32 %v3381_v33, %v2160_v11 }
0x24dc   :  { %v2138_v25 = vsub.f32 %v3383_v63, %v2137_v48 }
0x24dd   :  { %2275 = vst.msk [vmem:[%s3464_s9 + $0x28] sm:$0xff] %vm2027_vm4, %v2161_v49 }
0x24de   :  { %2274 = vst.msk [vmem:[%s3464_s9 + $0x20] sm:$0xff] %vm2027_vm4, %v2138_v25 }
0x24e4   :  { %v2886_v38 = vpop.eup %2885 }
0x24e5   :  { %v1781_v50 = vadd.f32 1.0, %v2886_v38 }
0x24e7   :  { %2887 = vrcp.f32 %v1781_v50 }
0x24f1   :  { %v2888_v55 = vpop.eup %2887 }
0x24f2   :  { %v1785_v63 = vmul.f32 %v2888_v55, %v3303_v37 }
0x2511   :  { %v1788_v33 = vpop.permute.xlu0 %1787 }
0x2512   :  { %v1790_v56 = vmul.f32 %v2888_v55, %v1788_v33 }
0x2514   :  { %1792 = vrot.lane.b32.xlu1 %v1790_v56, %s2910_s12 }
0x2586   :  { %v1793_v57 = vpop.permute.xlu1 %1792 }
0x2587   :  { %v1795_v19 = vadd.f32 %v1793_v57, %v1785_v63 }
0x2589   :  { %2889 = vtanh.f32 %v1795_v19 }
0x2593   :  { %v2890_v59 = vpop.eup %2889 }
0x2594   :  { %1798 = vrot.lane.b32.xlu0 %v2890_v59, %s2910_s12 }
0x2606   :  { %v1799_v60 = vpop.permute.xlu0 %1798 }
0x2607   :  { %v1801_v62 = vmul.f32 %v2888_v55, %v1799_v60 }
0x2609   :  { %1803 = vrot.lane.b32.xlu1 %v1801_v62, %s2911_s3 }
0x267b   :  { %v1804_v14 = vpop.permute.xlu1 %1803 }
0x267c   :  { %2602 = vmatmul.mubr.msk.f32.vlgmr.msra.gmra.mrb[22].mxu1 %vm183_vm2, %v1804_v14  ;;  %2621 = vmatprep.mubr.msk.f32.mxu0 %vm183_vm2, %v1804_v14 }
0x274f   :  { %v1873_v1 = vpop.f32.mrb[22].mxu1 }
0x2750   :  { %v1877_v37 = vadd.f32 %v1873_v1, %v1104_v0  ;;  %v2603_v51 = vpop.f32.mrb[23].mxu1 }
0x2752   :  { %2891 = vtanh.f32 %v1877_v37  ;;  %v2261_v16 = vmul.f32 -1.442695, %v1877_v37 }
0x2754   :  { %2893 = vpow2.f32 %v2261_v16 }
0x275c   :  { %v2892_v2 = vpop.eup %2891 }
0x275d   :  { %1887 = vrot.lane.b32.xlu0 %v2892_v2, %s2910_s12 }
0x275e   :  { %v2894_v3 = vpop.eup %2893 }
0x275f   :  { %v1881_v10 = vadd.f32 1.0, %v2894_v3 }
0x2761   :  { %2895 = vrcp.f32 %v1881_v10 }
0x276b   :  { %v2896_v54 = vpop.eup %2895 }
0x276c   :  { %v1885_v22 = vmul.f32 %v2896_v54, %v1795_v19 }
0x27cf   :  { %v1888_v4 = vpop.permute.xlu0 %1887 }
0x27d0   :  { %v1890_v21 = vmul.f32 %v2896_v54, %v1888_v4 }
0x27d2   :  { %1892 = vrot.lane.b32.xlu1 %v1890_v21, %s2910_s12 }
0x2844   :  { %v1893_v8 = vpop.permute.xlu1 %1892 }
0x2845   :  { %v1895_v61 = vadd.f32 %v1893_v8, %v1885_v22 }
0x2847   :  { %2897 = vtanh.f32 %v1895_v61 }
0x2851   :  { %v2898_v52 = vpop.eup %2897 }
0x2852   :  { %1898 = vrot.lane.b32.xlu0 %v2898_v52, %s2910_s12 }
0x28c4   :  { %v1899_v5 = vpop.permute.xlu0 %1898 }
0x28c5   :  { %v1901_v36 = vmul.f32 %v2896_v54, %v1899_v5 }
0x28c7   :  { %1914 = vrot.lane.b32.xlu1 %v1901_v36, %s2911_s3 }
0x2939   :  { %v1915_v7 = vpop.permute.xlu1 %1914 }
0x293a   :  { %2622 = vmatmul.mubr.msk.f32.gmra.mrb[30].mxu0 %vm183_vm2, %v1915_v7 }
0x2a0d   :  { %v2623_v9 = vpop.f32.mrb[30].mxu0 }
0x2a0e   :  { %v2020_v12 = vadd.f32 %v2623_v9, %v3341_v15  ;;  %v2014_v17 = vpop.f32.mrb[31].mxu0 }
0x2a0f   :  { %v2015_v13 = vadd.f32 %v3341_v15, %v2014_v17 }
0x2a10   :  { %v2187_v28 = vsel %vm2025_vm3, %v2020_v12, -1e+30 }
0x2a11   :  { %v2188_v18 = vsel %vm2027_vm4, %v2187_v28, -inf  ;;  %v2164_v20 = vsel %vm2025_vm3, %v2015_v13, -1e+30 }
0x2a12   :  { %v2189_v24 = vrot.slane %v2188_v18, 4  ;;  %v2165_v53 = vsel %vm2027_vm4, %v2164_v20, -inf }
0x2a13   :  { %v2166_v29 = vrot.slane %v2165_v53, 4 }
0x2a14   :  { %v2190_v41 = vmax.f32 %v2188_v18, %v2189_v24 }
0x2a15   :  { %v2167_v30 = vmax.f32 %v2165_v53, %v2166_v29 }
0x2a16   :  { %v2191_v35 = vrot.slane %v2190_v41, 2 }
0x2a17   :  { %v2168_v31 = vrot.slane %v2167_v30, 2 }
0x2a18   :  { %v2192_v32 = vmax.f32 %v2190_v41, %v2191_v35 }
0x2a19   :  { %v2169_v26 = vmax.f32 %v2167_v30, %v2168_v31 }
0x2a1a   :  { %v2193_v39 = vrot.slane %v2192_v32, 1 }
0x2a1b   :  { %v2170_v15 = vrot.slane %v2169_v26, 1 }
0x2a1c   :  { %v2194_v23 = vmax.f32 %v2192_v32, %v2193_v39 }
0x2a1d   :  { %v2171_v40 = vmax.f32 %v2169_v26, %v2170_v15 }
0x2a1e   :  { %v2195_v42 = vsub.f32 %v2187_v28, %v2194_v23 }
0x2a1f   :  { %v2172_v43 = vsub.f32 %v2164_v20, %v2171_v40 }
0x2a20   :  { %v2196_v44 = vmul.f32 1.442695, %v2195_v42 }
0x2a21   :  { %v2173_v45 = vmul.f32 1.442695, %v2172_v43 }
0x2a22   :  { %2899 = vpow2.f32 %v2196_v44 }
0x2a23   :  { %2901 = vpow2.f32 %v2173_v45 }
0x2a2c   :  { %v2900_v58 = vpop.eup %2899 }
0x2a2d   :  { %v2902_v46 = vpop.eup %2901  ;;  %v2198_v34 = vsel %vm2027_vm4, %v2900_v58, 0.0 }
0x2a2e   :  { %v2199_v6 = vrot.slane %v2198_v34, 4  ;;  %v2175_v47 = vsel %vm2027_vm4, %v2902_v46, 0.0 }
0x2a2f   :  { %v2176_v11 = vrot.slane %v2175_v47, 4 }
0x2a30   :  { %v2200_v48 = vadd.f32 %v2199_v6, %v2198_v34 }
0x2a31   :  { %v2177_v49 = vadd.f32 %v2176_v11, %v2175_v47 }
0x2a32   :  { %v2201_v25 = vrot.slane %v2200_v48, 2 }
0x2a33   :  { %v2178_v27 = vrot.slane %v2177_v49, 2 }
0x2a34   :  { %v2202_v38 = vadd.f32 %v2201_v25, %v2200_v48 }
0x2a35   :  { %v2179_v50 = vadd.f32 %v2178_v27, %v2177_v49 }
0x2a36   :  { %v2203_v55 = vrot.slane %v2202_v38, 1 }
0x2a37   :  { %v2180_v33 = vrot.slane %v2179_v50, 1 }
0x2a38   :  { %v2204_v56 = vadd.f32 %v2203_v55, %v2202_v38 }
0x2a39   :  { %v2181_v63 = vadd.f32 %v2180_v33, %v2179_v50 }
0x2a3a   :  { %2903 = vlog2.f32 %v2204_v56 }
0x2a3b   :  { %2905 = vlog2.f32 %v2181_v63 }
0x2a44   :  { %v2904_v57 = vpop.eup %2903 }
0x2a45   :  { %v2906_v19 = vpop.eup %2905  ;;  %v2206_v59 = vmul.f32 0.6931472, %v2904_v57 }
0x2a46   :  { %v2183_v60 = vmul.f32 0.6931472, %v2906_v19 }
0x2a47   :  { %v2207_v62 = vsub.f32 %v2195_v42, %v2206_v59 }
0x2a48   :  { %v2184_v14 = vsub.f32 %v2172_v43, %v2183_v60 }
0x2a49   :  { %2277 = vst.msk [vmem:[%s3464_s9 + $0x38] sm:$0xff] %vm2027_vm4, %v2207_v62 }
0x2a4a   :  { %2276 = vst.msk [vmem:[%s3464_s9 + $0x30] sm:$0xff] %vm2027_vm4, %v2184_v14 }

</bundles_post_ra>
